<compile_context>
chip_gen: v6e
topology: v6e:2x2x1
jax: 0.10.0
libtpu: 0.0.40
codegen_flags: <defaults>
</compile_context>

<pallas_src>
import functools

import jax
import jax.numpy as jnp
import numpy as np
from jax.experimental import pallas as pl
from jax.experimental.pallas import tpu as pltpu

LEAKY_SLOPE = 0.01   # PyTorch nn.LeakyReLU default negative_slope
BN_EPS = 1e-5        # PyTorch nn.BatchNorm1d default eps
_MAX_TILE = 2048     # lane-tile width (multiple of 128); amortizes per-grid-step overhead


def _leaky(x):
    # max(x, a*x) == LeakyReLU(x) for a < 1: 2 VALU ops instead of cmp+mul+select.
    return jnp.maximum(x, LEAKY_SLOPE * x)


def _round_up(x, m):
    return (x + m - 1) // m * m


# ----------------------------- pass 1 kernel ---------------------------------
def _score_accum_kernel(xT_ref, *refs):
    """Diet MLP + Linear(hidden->1) + mixing layer 1 (D->mix) lane-reduce.

    refs = (w1, b1, ..., wL, bL, wo_col, bo, wm1_tile, h_out)
      xT_ref   : (M, T)     embedding tile, D on lanes
      wK/bK    : (hK, hK-1) / (hK, 1)   BN(eval) folded in; Dropout = identity
      wo_col   : (hL, 1), bo : (1, 1)   final projection (last BN folded in)
      wm1_tile : (mix, T)
      h_out    : (mix, 1)   accumulator, resident across the D grid axis
    The D grid axis is a reduction axis for h_out -> marked "arbitrary".
    """
    h_ref, wm1_ref, bo_ref, wo_ref = refs[-1], refs[-2], refs[-3], refs[-4]
    layer_refs = refs[:-4]

    t = pl.program_id(0)

    @pl.when(t == 0)
    def _():
        h_ref[...] = jnp.zeros_like(h_ref)

    x = xT_ref[...]                                                         # (M, T)
    for i in range(0, len(layer_refs), 2):
        w_ref, b_ref = layer_refs[i], layer_refs[i + 1]
        # MXU matmul with N = T (lane-dense).
        x = _leaky(jnp.dot(w_ref[...], x, preferred_element_type=jnp.float32)
                   + b_ref[...])

    # Linear(hidden -> 1): VPU broadcast-mul + sublane reduce (avoids an N=1 MXU matmul).
    score = jnp.sum(x * wo_ref[...], axis=0, keepdims=True) + bo_ref[...]   # (1, T)

    # Mixing layer 1 (D -> mix, no bias): partial lane-reduce, accumulated over all D tiles.
    h_ref[...] += jnp.sum(score * wm1_ref[...], axis=-1, keepdims=True)     # (mix, 1)

    @pl.when(t == pl.num_programs(0) - 1)
    def _():
        # LeakyReLU only once the full-D reduction is complete.
        h_ref[...] = _leaky(h_ref[...])


# ----------------------------- pass 2 kernel ---------------------------------
def _mixing_out_kernel(h_ref, wm2T_ref, out_ref):
    """Mixing layer 2 (mix -> D, no bias) + sigmoid; pure streaming, parallel over D tiles."""
    o = jnp.sum(h_ref[...] * wm2T_ref[...], axis=0, keepdims=True)          # (1, T)
    out_ref[...] = jax.nn.sigmoid(o)


# ----------------------------- parameter prep (cache me) ---------------------
def prepare_params(embedding_matrix, params, max_tile=_MAX_TILE):
    """One-time prep: fold eval-mode BatchNorm into the Linears, build lane-dense
    transposes, and zero-pad the D axis to a multiple of the lane tile."""
    D, M = embedding_matrix.shape
    layers = params["layers"]

    scales, shifts = [], []
    for lyr in layers:
        s = lyr["gamma"] / jnp.sqrt(lyr["rv"] + BN_EPS)
        shifts.append(lyr["beta"] - lyr["rm"] * s)
        scales.append(s)

    ws, bs = [], []
    for k, lyr in enumerate(layers):
        w, b = lyr["w"], lyr["b"]
        if k > 0:
            # Linear(W, b) applied to (s*h + t)  ==  Linear(W*s, W@t + b) applied to h.
            b = w @ shifts[k - 1] + b
            w = w * scales[k - 1][None, :]
        ws.append(w.astype(jnp.float32))
        bs.append(b.astype(jnp.float32)[:, None])     # bias column -> broadcasts over lanes

    wo, bo = params["wo"], params["bo"]
    bo_f = (wo @ shifts[-1] + bo).reshape(1, 1).astype(jnp.float32)
    wo_col = (wo * scales[-1][None, :]).reshape(-1, 1).astype(jnp.float32)

    d128 = _round_up(D, 128)
    tile = d128 if d128 <= max_tile else max_tile
    d_pad = _round_up(D, tile)
    pad = d_pad - D

    xT = embedding_matrix.T.astype(jnp.float32)       # (M, D): D on lanes everywhere
    wm1 = params["wm1"].astype(jnp.float32)           # (mix, D)
    wm2T = params["wm2"].T.astype(jnp.float32)        # (mix, D)
    if pad:
        # Zero wm1/wm2T columns make padded features contribute nothing.
        xT = jnp.pad(xT, ((0, 0), (0, pad)))
        wm1 = jnp.pad(wm1, ((0, 0), (0, pad)))
        wm2T = jnp.pad(wm2T, ((0, 0), (0, pad)))

    return dict(xT=xT, ws=tuple(ws), bs=tuple(bs), wo_col=wo_col, bo_f=bo_f,
                wm1=wm1, wm2T=wm2T, d_out=D, tile=tile)


# ----------------------------- forward ---------------------------------------
@functools.partial(jax.jit, static_argnames=("d_out", "tile"))
def _forward_impl(xT, ws, bs, wo_col, bo_f, wm1, wm2T, *, d_out, tile):
    M, d_pad = xT.shape
    mix = wm1.shape[0]
    n_tiles = d_pad // tile
    h_max = max(w.shape[0] for w in ws)

    # Generous VMEM budget: double-buffered streamed tiles + a few activation slabs,
    # clamped to stay portable across v5e / v6e / v7x scoped limits.
    stream = 2 * (M + 2 * mix + 1) * tile * 4
    acts = 4 * h_max * tile * 4
    vmem_limit = int(min(max(3 * (stream + acts), 16 * 2**20), 48 * 2**20))

    # ---- pass 1: diet MLP + wo projection + mixing layer 1 (reduction over D tiles) ----
    in_specs = [pl.BlockSpec((M, tile), lambda t: (0, t))]
    args = [xT]
    for w, b in zip(ws, bs):
        in_specs += [pl.BlockSpec(w.shape, lambda t: (0, 0)),
                     pl.BlockSpec(b.shape, lambda t: (0, 0))]
        args += [w, b]
    in_specs += [pl.BlockSpec(wo_col.shape, lambda t: (0, 0)),
                 pl.BlockSpec(bo_f.shape, lambda t: (0, 0)),
                 pl.BlockSpec((mix, tile), lambda t: (0, t))]
    args += [wo_col, bo_f, wm1]

    mm_flops = sum(2 * w.shape[0] * w.shape[1] for w in ws)
    flops1 = d_pad * (mm_flops + 2 * ws[-1].shape[0] + 2 * mix)
    bytes1 = 4 * (d_pad * (M + mix)
                  + sum(w.size + b.size for w, b in zip(ws, bs))
                  + wo_col.size + 1 + mix)

    h = pl.pallas_call(
        _score_accum_kernel,
        out_shape=jax.ShapeDtypeStruct((mix, 1), jnp.float32),
        grid_spec=pltpu.PrefetchScalarGridSpec(
            num_scalar_prefetch=0,
            grid=(n_tiles,),
            in_specs=in_specs,
            out_specs=pl.BlockSpec((mix, 1), lambda t: (0, 0)),
        ),
        compiler_params=pltpu.CompilerParams(
            dimension_semantics=("arbitrary",),          # output accumulator across D tiles
            vmem_limit_bytes=vmem_limit,
        ),
        cost_estimate=pl.CostEstimate(flops=flops1, transcendentals=0,
                                      bytes_accessed=bytes1),
    )(*args)

    # ---- pass 2: mixing layer 2 + sigmoid (embarrassingly parallel over D tiles) ----
    out = pl.pallas_call(
        _mixing_out_kernel,
        out_shape=jax.ShapeDtypeStruct((1, d_pad), jnp.float32),
        grid_spec=pltpu.PrefetchScalarGridSpec(
            num_scalar_prefetch=0,
            grid=(n_tiles,),
            in_specs=[pl.BlockSpec((mix, 1), lambda t: (0, 0)),
                      pl.BlockSpec((mix, tile), lambda t: (0, t))],
            out_specs=pl.BlockSpec((1, tile), lambda t: (0, t)),
        ),
        compiler_params=pltpu.CompilerParams(
            dimension_semantics=("parallel",),           # shardable across v7x TensorCores
            vmem_limit_bytes=vmem_limit,
        ),
        cost_estimate=pl.CostEstimate(flops=2 * d_pad * mix, transcendentals=d_pad,
                                      bytes_accessed=4 * (d_pad * (mix + 1) + mix)),
    )(h, wm2T)

    return out[0, :d_out]                                # == torch.squeeze(sigmoid(out), 1)


def sparsity_network_forward(prepped):
    """prepped = prepare_params(embedding_matrix, params). Returns (D,) sigmoid gates."""
    return _forward_impl(prepped["xT"], prepped["ws"], prepped["bs"],
                         prepped["wo_col"], prepped["bo_f"],
                         prepped["wm1"], prepped["wm2T"],
                         d_out=prepped["d_out"], tile=prepped["tile"])


# ----------------------------- reference & init ------------------------------
def reference_forward(emb, params):
    x = emb
    for lyr in params["layers"]:
        x = x @ lyr["w"].T + lyr["b"]
        x = jnp.where(x >= 0, x, LEAKY_SLOPE * x)
        x = (x - lyr["rm"]) / jnp.sqrt(lyr["rv"] + BN_EPS) * lyr["gamma"] + lyr["beta"]
    x = x @ params["wo"].T + params["bo"]                 # (D, 1)
    s = x.T                                               # (1, D)
    h = s @ params["wm1"].T
    h = jnp.where(h >= 0, h, LEAKY_SLOPE * h)
    o = (h @ params["wm2"].T).T                           # (D, 1)
    return jax.nn.sigmoid(o)[:, 0]


def init_params(key, D, M, diet_dims, mixing_layer_size):
    keys = iter(jax.random.split(key, 64))
    layers = []
    dim_prev = M
    for dim in diet_dims:
        bound = 1.0 / np.sqrt(dim_prev)
        layers.append(dict(
            w=jax.random.uniform(next(keys), (dim, dim_prev), jnp.float32, -bound, bound),
            b=jax.random.uniform(next(keys), (dim,), jnp.float32, -bound, bound),
            gamma=1.0 + 0.1 * jax.random.normal(next(keys), (dim,), jnp.float32),
            beta=0.1 * jax.random.normal(next(keys), (dim,), jnp.float32),
            rm=0.1 * jax.random.normal(next(keys), (dim,), jnp.float32),
            rv=1.0 + 0.1 * jax.random.uniform(next(keys), (dim,), jnp.float32),
        ))
        dim_prev = dim
    bound = 1.0 / np.sqrt(dim_prev)
    wo = jax.random.uniform(next(keys), (1, dim_prev), jnp.float32, -bound, bound)
    bo = jax.random.uniform(next(keys), (1,), jnp.float32, -bound, bound)
    # mixing layers: nn.init.uniform_(w, -0.005, 0.005), no bias
    wm1 = jax.random.uniform(next(keys), (mixing_layer_size, D), jnp.float32, -0.005, 0.005)
    wm2 = jax.random.uniform(next(keys), (D, mixing_layer_size), jnp.float32, -0.005, 0.005)
    return dict(layers=layers, wo=wo, bo=bo, wm1=wm1, wm2=wm2)


if __name__ == "__main__":
    # Small shapes: D = num_features = 256, M = args.wpn (embedding size) = 32,
    # args.diet_network_dims = [64, 64, 64, 64], args.mixing_layer_size = 32.
    D, M = 256, 32
    diet_dims = [64, 64, 64, 64]
    mixing_layer_size = 32

    key = jax.random.PRNGKey(0)
    k_emb, k_par = jax.random.split(key)
    embedding_matrix = jax.random.normal(k_emb, (D, M), jnp.float32)
    params = init_params(k_par, D, M, diet_dims, mixing_layer_size)
    # NOTE: the forward's `input` (B, D) patient tensor is unused for sparsity_type='global'.

    ref = reference_forward(embedding_matrix, params)

    # Default tiling (single tile at this D).
    prepped = prepare_params(embedding_matrix, params)
    out = jax.block_until_ready(sparsity_network_forward(prepped))
    assert out.shape == (D,)
    np.testing.assert_allclose(np.asarray(out), np.asarray(ref), rtol=1e-5, atol=1e-5)

    # Forced small tile (128) to exercise the multi-tile D reduction / streaming path.
    prepped_tiled = prepare_params(embedding_matrix, params, max_tile=128)
    out_tiled = jax.block_until_ready(sparsity_network_forward(prepped_tiled))
    np.testing.assert_allclose(np.asarray(out_tiled), np.asarray(ref), rtol=1e-5, atol=1e-5)

    print("KERNEL_OK")
</pallas_src>

<mosaic_0001>
module attributes {stable_mosaic.version = 11 : i64} {
  func.func @_mixing_out_kernel(%arg0: i32, %arg1: memref<32x1xf32, #tpu.memory_space<vmem>>, %arg2: memref<32x256xf32, #tpu.memory_space<vmem>>, %arg3: memref<1x256xf32, #tpu.memory_space<vmem>>) attributes {dimension_semantics = [#tpu.dimension_semantics<parallel>], iteration_bounds = array<i64: 1>, scalar_prefetch = 0 : i64, scratch_operands = 0 : i64, tpu.core_type = #tpu.core_type<tc>, window_params = [{pipeline_mode = #tpu.pipeline_mode<synchronous>, transform_indices = @transform_0, window_bounds = array<i64: 32, 1>}, {transform_indices = @transform_1, window_bounds = array<i64: 32, 256>}, {transform_indices = @transform_2, window_bounds = array<i64: 1, 256>}]} {
    %c0 = arith.constant 0 : index
    %c0_0 = arith.constant 0 : index
    %0 = vector.load %arg1[%c0, %c0_0] : memref<32x1xf32, #tpu.memory_space<vmem>>, vector<32x1xf32>
    %c0_1 = arith.constant 0 : index
    %c0_2 = arith.constant 0 : index
    %1 = vector.load %arg2[%c0_1, %c0_2] : memref<32x256xf32, #tpu.memory_space<vmem>>, vector<32x256xf32>
    %2 = vector.broadcast %0 : vector<32x1xf32> to vector<32x256xf32>
    %3 = arith.mulf %2, %1 : vector<32x256xf32>
    %cst = arith.constant dense<0.000000e+00> : vector<256xf32>
    %4 = vector.multi_reduction <add>, %3, %cst [0] : vector<32x256xf32> to vector<256xf32>
    %5 = vector.shape_cast %4 : vector<256xf32> to vector<1x256xf32>
    %6 = arith.negf %5 : vector<1x256xf32>
    %7 = math.exp %6 : vector<1x256xf32>
    %cst_3 = arith.constant 1.000000e+00 : f32
    %8 = vector.broadcast %cst_3 : f32 to vector<1x256xf32>
    %9 = arith.addf %8, %7 : vector<1x256xf32>
    %10 = arith.divf %8, %9 : vector<1x256xf32>
    %c0_4 = arith.constant 0 : index
    %c0_5 = arith.constant 0 : index
    %11 = vector.load %arg3[%c0_4, %c0_5] : memref<1x256xf32, #tpu.memory_space<vmem>>, vector<1x256xf32>
    tpu.vector_store %arg3[%c0_4, %c0_5], %10 {strides = array<i32>} : memref<1x256xf32, #tpu.memory_space<vmem>>, vector<1x256xf32>,
    return
  }
  func.func @transform_0(%arg0: i32) -> (i32, i32) {
    %c0_i32 = arith.constant 0 : i32
    %c0_i32_0 = arith.constant 0 : i32
    %c0_i32_1 = arith.constant 0 : i32
    return %c0_i32, %c0_i32_0 : i32, i32
  }
  func.func @transform_1(%arg0: i32) -> (i32, i32) {
    %c0_i32 = arith.constant 0 : i32
    %c0_i32_0 = arith.constant 0 : i32
    return %c0_i32, %arg0 : i32, i32
  }
  func.func @transform_2(%arg0: i32) -> (i32, i32) {
    %c0_i32 = arith.constant 0 : i32
    %c0_i32_0 = arith.constant 0 : i32
    return %c0_i32, %arg0 : i32, i32
  }
}

module attributes {stable_mosaic.version = 11 : i64} {
  func.func @_score_accum_kernel(%arg0: i32, %arg1: memref<32x256xf32, #tpu.memory_space<vmem>>, %arg2: memref<64x32xf32, #tpu.memory_space<vmem>>, %arg3: memref<64x1xf32, #tpu.memory_space<vmem>>, %arg4: memref<64x64xf32, #tpu.memory_space<vmem>>, %arg5: memref<64x1xf32, #tpu.memory_space<vmem>>, %arg6: memref<64x64xf32, #tpu.memory_space<vmem>>, %arg7: memref<64x1xf32, #tpu.memory_space<vmem>>, %arg8: memref<64x64xf32, #tpu.memory_space<vmem>>, %arg9: memref<64x1xf32, #tpu.memory_space<vmem>>, %arg10: memref<64x1xf32, #tpu.memory_space<vmem>>, %arg11: memref<1x1xf32, #tpu.memory_space<vmem>>, %arg12: memref<32x256xf32, #tpu.memory_space<vmem>>, %arg13: memref<32x1xf32, #tpu.memory_space<vmem>>) attributes {dimension_semantics = [#tpu.dimension_semantics<arbitrary>], iteration_bounds = array<i64: 1>, scalar_prefetch = 0 : i64, scratch_operands = 0 : i64, tpu.core_type = #tpu.core_type<tc>, window_params = [{transform_indices = @transform_0, window_bounds = array<i64: 32, 256>}, {pipeline_mode = #tpu.pipeline_mode<synchronous>, transform_indices = @transform_1, window_bounds = array<i64: 64, 32>}, {pipeline_mode = #tpu.pipeline_mode<synchronous>, transform_indices = @transform_2, window_bounds = array<i64: 64, 1>}, {pipeline_mode = #tpu.pipeline_mode<synchronous>, transform_indices = @transform_3, window_bounds = array<i64: 64, 64>}, {pipeline_mode = #tpu.pipeline_mode<synchronous>, transform_indices = @transform_4, window_bounds = array<i64: 64, 1>}, {pipeline_mode = #tpu.pipeline_mode<synchronous>, transform_indices = @transform_5, window_bounds = array<i64: 64, 64>}, {pipeline_mode = #tpu.pipeline_mode<synchronous>, transform_indices = @transform_6, window_bounds = array<i64: 64, 1>}, {pipeline_mode = #tpu.pipeline_mode<synchronous>, transform_indices = @transform_7, window_bounds = array<i64: 64, 64>}, {pipeline_mode = #tpu.pipeline_mode<synchronous>, transform_indices = @transform_8, window_bounds = array<i64: 64, 1>}, {pipeline_mode = #tpu.pipeline_mode<synchronous>, transform_indices = @transform_9, window_bounds = array<i64: 64, 1>}, {pipeline_mode = #tpu.pipeline_mode<synchronous>, transform_indices = @transform_10, window_bounds = array<i64: 1, 1>}, {transform_indices = @transform_11, window_bounds = array<i64: 32, 256>}, {pipeline_mode = #tpu.pipeline_mode<synchronous>, transform_indices = @transform_12, window_bounds = array<i64: 32, 1>}]} {
    %c0_i32 = arith.constant 0 : i32
    %0 = arith.cmpi eq, %arg0, %c0_i32 : i32
    %1 = arith.extui %0 : i1 to i32
    %c0_i32_0 = arith.constant 0 : i32
    %2 = arith.cmpi ne, %1, %c0_i32_0 : i32
    scf.if %2 {
      %cst_39 = arith.constant 0.000000e+00 : f32
      %55 = vector.broadcast %cst_39 : f32 to vector<32x1xf32>
      %c0_40 = arith.constant 0 : index
      %c0_41 = arith.constant 0 : index
      %56 = vector.load %arg13[%c0_40, %c0_41] : memref<32x1xf32, #tpu.memory_space<vmem>>, vector<32x1xf32>
      tpu.vector_store %arg13[%c0_40, %c0_41], %55 {strides = array<i32>} : memref<32x1xf32, #tpu.memory_space<vmem>>, vector<32x1xf32>,
    } else {
    }
    %c0 = arith.constant 0 : index
    %c0_1 = arith.constant 0 : index
    %3 = vector.load %arg1[%c0, %c0_1] : memref<32x256xf32, #tpu.memory_space<vmem>>, vector<32x256xf32>
    %c0_2 = arith.constant 0 : index
    %c0_3 = arith.constant 0 : index
    %4 = vector.load %arg2[%c0_2, %c0_3] : memref<64x32xf32, #tpu.memory_space<vmem>>, vector<64x32xf32>
    %cst = arith.constant dense<0.000000e+00> : vector<64x256xf32>
    %5 = tpu.matmul %4, %3, %cst {dimension_numbers = #tpu.dot_dimension_numbers<[1], [0], [0], [1], [0, 0, 1, 1], [], []>} : vector<64x32xf32>, vector<32x256xf32>, vector<64x256xf32> -> vector<64x256xf32>
    %c0_4 = arith.constant 0 : index
    %c0_5 = arith.constant 0 : index
    %6 = vector.load %arg3[%c0_4, %c0_5] : memref<64x1xf32, #tpu.memory_space<vmem>>, vector<64x1xf32>
    %7 = vector.broadcast %6 : vector<64x1xf32> to vector<64x256xf32>
    %8 = arith.addf %5, %7 : vector<64x256xf32>
    %cst_6 = arith.constant 0.00999999977 : f32
    %9 = vector.broadcast %cst_6 : f32 to vector<64x256xf32>
    %10 = arith.mulf %9, %8 : vector<64x256xf32>
    %11 = arith.maximumf %8, %10 : vector<64x256xf32>
    %c0_7 = arith.constant 0 : index
    %c0_8 = arith.constant 0 : index
    %12 = vector.load %arg4[%c0_7, %c0_8] : memref<64x64xf32, #tpu.memory_space<vmem>>, vector<64x64xf32>
    %cst_9 = arith.constant dense<0.000000e+00> : vector<64x256xf32>
    %13 = tpu.matmul %12, %11, %cst_9 {dimension_numbers = #tpu.dot_dimension_numbers<[1], [0], [0], [1], [0, 0, 1, 1], [], []>} : vector<64x64xf32>, vector<64x256xf32>, vector<64x256xf32> -> vector<64x256xf32>
    %c0_10 = arith.constant 0 : index
    %c0_11 = arith.constant 0 : index
    %14 = vector.load %arg5[%c0_10, %c0_11] : memref<64x1xf32, #tpu.memory_space<vmem>>, vector<64x1xf32>
    %15 = vector.broadcast %14 : vector<64x1xf32> to vector<64x256xf32>
    %16 = arith.addf %13, %15 : vector<64x256xf32>
    %cst_12 = arith.constant 0.00999999977 : f32
    %17 = vector.broadcast %cst_12 : f32 to vector<64x256xf32>
    %18 = arith.mulf %17, %16 : vector<64x256xf32>
    %19 = arith.maximumf %16, %18 : vector<64x256xf32>
    %c0_13 = arith.constant 0 : index
    %c0_14 = arith.constant 0 : index
    %20 = vector.load %arg6[%c0_13, %c0_14] : memref<64x64xf32, #tpu.memory_space<vmem>>, vector<64x64xf32>
    %cst_15 = arith.constant dense<0.000000e+00> : vector<64x256xf32>
    %21 = tpu.matmul %20, %19, %cst_15 {dimension_numbers = #tpu.dot_dimension_numbers<[1], [0], [0], [1], [0, 0, 1, 1], [], []>} : vector<64x64xf32>, vector<64x256xf32>, vector<64x256xf32> -> vector<64x256xf32>
    %c0_16 = arith.constant 0 : index
    %c0_17 = arith.constant 0 : index
    %22 = vector.load %arg7[%c0_16, %c0_17] : memref<64x1xf32, #tpu.memory_space<vmem>>, vector<64x1xf32>
    %23 = vector.broadcast %22 : vector<64x1xf32> to vector<64x256xf32>
    %24 = arith.addf %21, %23 : vector<64x256xf32>
    %cst_18 = arith.constant 0.00999999977 : f32
    %25 = vector.broadcast %cst_18 : f32 to vector<64x256xf32>
    %26 = arith.mulf %25, %24 : vector<64x256xf32>
    %27 = arith.maximumf %24, %26 : vector<64x256xf32>
    %c0_19 = arith.constant 0 : index
    %c0_20 = arith.constant 0 : index
    %28 = vector.load %arg8[%c0_19, %c0_20] : memref<64x64xf32, #tpu.memory_space<vmem>>, vector<64x64xf32>
    %cst_21 = arith.constant dense<0.000000e+00> : vector<64x256xf32>
    %29 = tpu.matmul %28, %27, %cst_21 {dimension_numbers = #tpu.dot_dimension_numbers<[1], [0], [0], [1], [0, 0, 1, 1], [], []>} : vector<64x64xf32>, vector<64x256xf32>, vector<64x256xf32> -> vector<64x256xf32>
    %c0_22 = arith.constant 0 : index
    %c0_23 = arith.constant 0 : index
    %30 = vector.load %arg9[%c0_22, %c0_23] : memref<64x1xf32, #tpu.memory_space<vmem>>, vector<64x1xf32>
    %31 = vector.broadcast %30 : vector<64x1xf32> to vector<64x256xf32>
    %32 = arith.addf %29, %31 : vector<64x256xf32>
    %cst_24 = arith.constant 0.00999999977 : f32
    %33 = vector.broadcast %cst_24 : f32 to vector<64x256xf32>
    %34 = arith.mulf %33, %32 : vector<64x256xf32>
    %35 = arith.maximumf %32, %34 : vector<64x256xf32>
    %c0_25 = arith.constant 0 : index
    %c0_26 = arith.constant 0 : index
    %36 = vector.load %arg10[%c0_25, %c0_26] : memref<64x1xf32, #tpu.memory_space<vmem>>, vector<64x1xf32>
    %37 = vector.broadcast %36 : vector<64x1xf32> to vector<64x256xf32>
    %38 = arith.mulf %35, %37 : vector<64x256xf32>
    %cst_27 = arith.constant dense<0.000000e+00> : vector<256xf32>
    %39 = vector.multi_reduction <add>, %38, %cst_27 [0] : vector<64x256xf32> to vector<256xf32>
    %40 = vector.shape_cast %39 : vector<256xf32> to vector<1x256xf32>
    %c0_28 = arith.constant 0 : index
    %c0_29 = arith.constant 0 : index
    %41 = vector.load %arg11[%c0_28, %c0_29] : memref<1x1xf32, #tpu.memory_space<vmem>>, vector<1x1xf32>
    %42 = vector.broadcast %41 : vector<1x1xf32> to vector<1x256xf32>
    %43 = arith.addf %40, %42 : vector<1x256xf32>
    %c0_30 = arith.constant 0 : index
    %c0_31 = arith.constant 0 : index
    %44 = vector.load %arg13[%c0_30, %c0_31] : memref<32x1xf32, #tpu.memory_space<vmem>>, vector<32x1xf32>
    %c0_32 = arith.constant 0 : index
    %c0_33 = arith.constant 0 : index
    %45 = vector.load %arg12[%c0_32, %c0_33] : memref<32x256xf32, #tpu.memory_space<vmem>>, vector<32x256xf32>
    %46 = vector.broadcast %43 : vector<1x256xf32> to vector<32x256xf32>
    %47 = arith.mulf %46, %45 : vector<32x256xf32>
    %cst_34 = arith.constant dense<0.000000e+00> : vector<32xf32>
    %48 = vector.multi_reduction <add>, %47, %cst_34 [1] : vector<32x256xf32> to vector<32xf32>
    %49 = vector.shape_cast %48 : vector<32xf32> to vector<32x1xf32>
    %50 = arith.addf %44, %49 : vector<32x1xf32>
    %c0_35 = arith.constant 0 : index
    %c0_36 = arith.constant 0 : index
    %51 = vector.load %arg13[%c0_35, %c0_36] : memref<32x1xf32, #tpu.memory_space<vmem>>, vector<32x1xf32>
    tpu.vector_store %arg13[%c0_35, %c0_36], %50 {strides = array<i32>} : memref<32x1xf32, #tpu.memory_space<vmem>>, vector<32x1xf32>,
    %c0_i32_37 = arith.constant 0 : i32
    %52 = arith.cmpi eq, %arg0, %c0_i32_37 : i32
    %53 = arith.extui %52 : i1 to i32
    %c0_i32_38 = arith.constant 0 : i32
    %54 = arith.cmpi ne, %53, %c0_i32_38 : i32
    scf.if %54 {
      %c0_39 = arith.constant 0 : index
      %c0_40 = arith.constant 0 : index
      %55 = vector.load %arg13[%c0_39, %c0_40] : memref<32x1xf32, #tpu.memory_space<vmem>>, vector<32x1xf32>
      %cst_41 = arith.constant 0.00999999977 : f32
      %56 = vector.broadcast %cst_41 : f32 to vector<32x1xf32>
      %57 = arith.mulf %56, %55 : vector<32x1xf32>
      %58 = arith.maximumf %55, %57 : vector<32x1xf32>
      %c0_42 = arith.constant 0 : index
      %c0_43 = arith.constant 0 : index
      %59 = vector.load %arg13[%c0_42, %c0_43] : memref<32x1xf32, #tpu.memory_space<vmem>>, vector<32x1xf32>
      tpu.vector_store %arg13[%c0_42, %c0_43], %58 {strides = array<i32>} : memref<32x1xf32, #tpu.memory_space<vmem>>, vector<32x1xf32>,
    } else {
    }
    return
  }
  func.func @transform_0(%arg0: i32) -> (i32, i32) {
    %c0_i32 = arith.constant 0 : i32
    %c0_i32_0 = arith.constant 0 : i32
    return %c0_i32, %arg0 : i32, i32
  }
  func.func @transform_1(%arg0: i32) -> (i32, i32) {
    %c0_i32 = arith.constant 0 : i32
    %c0_i32_0 = arith.constant 0 : i32
    %c0_i32_1 = arith.constant 0 : i32
    return %c0_i32, %c0_i32_0 : i32, i32
  }
  func.func @transform_2(%arg0: i32) -> (i32, i32) {
    %c0_i32 = arith.constant 0 : i32
    %c0_i32_0 = arith.constant 0 : i32
    %c0_i32_1 = arith.constant 0 : i32
    return %c0_i32, %c0_i32_0 : i32, i32
  }
  func.func @transform_3(%arg0: i32) -> (i32, i32) {
    %c0_i32 = arith.constant 0 : i32
    %c0_i32_0 = arith.constant 0 : i32
    %c0_i32_1 = arith.constant 0 : i32
    return %c0_i32, %c0_i32_0 : i32, i32
  }
  func.func @transform_4(%arg0: i32) -> (i32, i32) {
    %c0_i32 = arith.constant 0 : i32
    %c0_i32_0 = arith.constant 0 : i32
    %c0_i32_1 = arith.constant 0 : i32
    return %c0_i32, %c0_i32_0 : i32, i32
  }
  func.func @transform_5(%arg0: i32) -> (i32, i32) {
    %c0_i32 = arith.constant 0 : i32
    %c0_i32_0 = arith.constant 0 : i32
    %c0_i32_1 = arith.constant 0 : i32
    return %c0_i32, %c0_i32_0 : i32, i32
  }
  func.func @transform_6(%arg0: i32) -> (i32, i32) {
    %c0_i32 = arith.constant 0 : i32
    %c0_i32_0 = arith.constant 0 : i32
    %c0_i32_1 = arith.constant 0 : i32
    return %c0_i32, %c0_i32_0 : i32, i32
  }
  func.func @transform_7(%arg0: i32) -> (i32, i32) {
    %c0_i32 = arith.constant 0 : i32
    %c0_i32_0 = arith.constant 0 : i32
    %c0_i32_1 = arith.constant 0 : i32
    return %c0_i32, %c0_i32_0 : i32, i32
  }
  func.func @transform_8(%arg0: i32) -> (i32, i32) {
    %c0_i32 = arith.constant 0 : i32
    %c0_i32_0 = arith.constant 0 : i32
    %c0_i32_1 = arith.constant 0 : i32
    return %c0_i32, %c0_i32_0 : i32, i32
  }
  func.func @transform_9(%arg0: i32) -> (i32, i32) {
    %c0_i32 = arith.constant 0 : i32
    %c0_i32_0 = arith.constant 0 : i32
    %c0_i32_1 = arith.constant 0 : i32
    return %c0_i32, %c0_i32_0 : i32, i32
  }
  func.func @transform_10(%arg0: i32) -> (i32, i32) {
    %c0_i32 = arith.constant 0 : i32
    %c0_i32_0 = arith.constant 0 : i32
    %c0_i32_1 = arith.constant 0 : i32
    return %c0_i32, %c0_i32_0 : i32, i32
  }
  func.func @transform_11(%arg0: i32) -> (i32, i32) {
    %c0_i32 = arith.constant 0 : i32
    %c0_i32_0 = arith.constant 0 : i32
    return %c0_i32, %arg0 : i32, i32
  }
  func.func @transform_12(%arg0: i32) -> (i32, i32) {
    %c0_i32 = arith.constant 0 : i32
    %c0_i32_0 = arith.constant 0 : i32
    %c0_i32_1 = arith.constant 0 : i32
    return %c0_i32, %c0_i32_0 : i32, i32
  }
}

</mosaic_0001>

<bundles_post_ra>
// kernel: _forward_impl.3
= control target key start
LH: loop header
LB: loop body
LE: loop exit
PB: predicated region body
PF: predicated region fallthrough
CT: control target
= control target key end

     0   :  { %v156_v2 = vmov 0   ;;  %s213_s0 = inlined_call_operand.vmem [shape: f32[32,1], index: 0, kind: input, shape index: {}]   ;;  %s214_s1 = inlined_call_operand.vmem [shape: f32[32,256], index: 1, kind: input, shape index: {}]   ;;  %s215_s2 = inlined_call_operand.hbm [shape: f32[1,256], index: 2, kind: output, shape index: {}]  }
   0x1   :  { %v14_v0 = vld [vmem:[%s213_s0 + $0x10] sm:$0xff]  ;;  %v12_v1 = vld [vmem:[%s213_s0] sm:$0xff]  ;;  %125 = vset.pattern.permute.xlu1 %v156_v2  ;;  %124 = vset.pattern.permute.xlu0 %v156_v2  ;;  %v15_v3 = vld [vmem:[%s213_s0 + $0x18] sm:$0xff] }
   0x2   :  { %36 = vperm.xlu1 %125, %v14_v0   ;;  %26 = vperm.xlu0 %124, %v12_v1   ;;  %v13_v4 = vld [vmem:[%s213_s0 + $0x8] sm:$0xff] }
   0x3   :  { %7 = vsyncpa [#allocation3], 0  ;;  %v16_v7 = vld [vmem:[%s214_s1] sm:$0xff]  ;;  %v17_v8 = vld [vmem:[%s214_s1 + $0x8] sm:$0xff]  ;;  %v157_v49 = vmov 1966171168   ;;  %v88_v51 = vlaneseq }
   0x4   :  { %v18_v9 = vld [vmem:[%s214_s1 + $0x10] sm:$0xff]  ;;  %v19_v10 = vld [vmem:[%s214_s1 + $0x18] sm:$0xff]  ;;  %v20_v11 = vld [vmem:[%s214_s1 + $0x20] sm:$0xff]  ;;  %v86_v50 = vunpack.c.l.s4 %v157_v49 }
   0x5   :  { %v21_v12 = vld [vmem:[%s214_s1 + $0x28] sm:$0xff]  ;;  %v22_v18 = vld [vmem:[%s214_s1 + $0x30] sm:$0xff]  ;;  %v23_v19 = vld [vmem:[%s214_s1 + $0x38] sm:$0xff]  ;;  %v89_v53 = vshrl.u32 %v88_v51, 7  ;;  %s158_s1 = smov [#allocation2]   ;;  %vm102_vm0 = vcmp.lt.s32.totalorder %v88_v51, 256 }
   0x6   :  { %41 = vperm.xlu1 %125, %v15_v3   ;;  %31 = vperm.xlu0 %124, %v13_v4   ;;  %v87_v52 = vunpack.c.0.s8 %v86_v50  ;;  %s111_s4 = sshll.u32 %s158_s1, 4  ;;  %s112_s4 = int_to_ptr.vmem [resolvable:$true] %s111_s4 }
   0x7   :  { %s134_s5 = scalar_lea.vmem %s112_s4, 32  ;;  %p139_p1 = scmp.lt.s32.totalorder %s112_s4, %s112_s4 }
   0x8   :  { %v90_v55 = vsub.s32 %v87_v52, %v89_v53  ;;  %p135_p0 = scmp.ne.s32.totalorder %s112_s4, %s134_s5  ;;  %p140_p2 = scmp.lt.s32.totalorder %s134_s5, %s134_s5 }
   0xa   :  { %p141_p3 = por %p140_p2, %p139_p1 }
   0xc   :  { %p142_p4 = pnand %p141_p3, %p135_p0 }
  0x7d   :  { %v37_v5 = vpop.permute.xlu1 %36  ;;  %v27_v6 = vpop.permute.xlu0 %26 }
  0x7e   :  { %v44_v14 = vmul.f32 %v27_v6, %v16_v7  ;;  %v45_v15 = vmul.f32 %v27_v6, %v17_v8  ;;  %v48_v21 = vmul.f32 %v37_v5, %v20_v11  ;;  %v49_v22 = vmul.f32 %v37_v5, %v21_v12 }
  0x81   :  { %v32_v13 = vpop.permute.xlu0 %31  ;;  %v42_v20 = vpop.permute.xlu1 %41 }
  0x82   :  { %v46_v16 = vmul.f32 %v32_v13, %v18_v9  ;;  %v47_v17 = vmul.f32 %v32_v13, %v19_v10  ;;  %v50_v25 = vmul.f32 %v42_v20, %v22_v18  ;;  %v51_v26 = vmul.f32 %v42_v20, %v23_v19 }
  0x84   :  { %v52_v23 = vadd.f32 %v46_v16, %v44_v14  ;;  %v61_v24 = vadd.f32 %v47_v17, %v45_v15 }
  0x86   :  { %v53_v27 = vadd.f32 %v52_v23, %v48_v21  ;;  %v62_v28 = vadd.f32 %v61_v24, %v49_v22 }
  0x88   :  { %v54_v29 = vadd.f32 %v53_v27, %v50_v25  ;;  %v63_v30 = vadd.f32 %v62_v28, %v51_v26 }
  0x8a   :  { %v55_v31 = vrot.slane %v54_v29, 4  ;;  %v64_v32 = vrot.slane %v63_v30, 4 }
  0x8c   :  { %v56_v33 = vadd.f32 %v55_v31, %v54_v29  ;;  %v65_v34 = vadd.f32 %v64_v32, %v63_v30 }
  0x8e   :  { %v57_v35 = vrot.slane %v56_v33, 2  ;;  %v66_v36 = vrot.slane %v65_v34, 2 }
  0x90   :  { %v58_v37 = vadd.f32 %v57_v35, %v56_v33  ;;  %v67_v38 = vadd.f32 %v66_v36, %v65_v34 }
  0x92   :  { %v59_v39 = vrot.slane %v58_v37, 1  ;;  %v68_v40 = vrot.slane %v67_v38, 1 }
  0x94   :  { %v60_v41 = vadd.f32 %v59_v39, %v58_v37  ;;  %v69_v42 = vadd.f32 %v68_v40, %v67_v38 }
  0x96   :  { %v119_v43 = vmul.f32 -1.442695, %v60_v41  ;;  %v120_v44 = vmul.f32 -1.442695, %v69_v42 }
  0x98   :  { %126 = vpow2.f32 %v119_v43 }
  0x99   :  { %128 = vpow2.f32 %v120_v44 }
  0xa5   :  { %v127_v45 = vpop.eup %126 }
  0xa6   :  { %v129_v46 = vpop.eup %128  ;;  %v76_v47 = vadd.f32 1.0, %v127_v45 }
  0xa7   :  { %v77_v48 = vadd.f32 1.0, %v129_v46 }
  0xa8   :  { %130 = vrcp.f32 %v76_v47 }
  0xa9   :  { %132 = vrcp.f32 %v77_v48 }
  0xb5   :  { %v131_v54 = vpop.eup %130 }
  0xb6   :  { %v133_v56 = vpop.eup %132 }
  0xb7   :  { %v84_v57 = vcombine.low %v131_v54, %v133_v56 }
  0xb9   :  { %v91_v58 = vrot.slane %v84_v57, %v90_v55 }
  0xbb   :  { %v98_v59 = vrot.slane %v91_v58, %v90_v55 }
  0xbd   :  { %104 = vst.msk [vmem:[#allocation2] sm:$0x3] %vm102_vm0, %v98_v59 }
  0xbe   :  { %145 = shalt.err (!%p142_p4)
}
  0xbf   :  { %114 = dma.vmem_to_hbm [thread:$0]  %s112_s4, 32, %s215_s2, [#allocation3]  }
  0xc0   :  { %154 = dma.done.wait [#allocation3], 32  }
  0xc1   :  { %155 = vsyncadd [#allocation3], 4294967264 }
  0xc2   :  { %118 = vsyncpa [#allocation3], 1 }

// kernel: _forward_impl.2
= control target key start
LH: loop header
LB: loop body
LE: loop exit
PB: predicated region body
PF: predicated region fallthrough
CT: control target
= control target key end

     0   :  { %v1180_v3 = vmov 0.0   ;;  %v1181_v4 = vmov 0   ;;  %vm116_vm0 = vcmask 261120   ;;  %vm342_vm1 = vcmask 523264   ;;  %s1657_s0 = inlined_call_operand.vmem [shape: f32[32,256], index: 0, kind: input, shape index: {}]   ;;  %s1658_s10 = inlined_call_operand.<no memory space> [shape: f32[1,1], index: 10, kind: input, shape index: {}]   ;;  %s1659_s2 = inlined_call_operand.vmem [shape: f32[64,1], index: 2, kind: input, shape index: {}]   ;;  %s1660_s1 = inlined_call_operand.vmem [shape: f32[64,32], index: 1, kind: input, shape index: {}]   ;;  %s1661_s4 = inlined_call_operand.vmem [shape: f32[64,1], index: 4, kind: input, shape index: {}]   ;;  %s1662_s6 = inlined_call_operand.vmem [shape: f32[64,1], index: 6, kind: input, shape index: {}]   ;;  %s1663_s8 = inlined_call_operand.vmem [shape: f32[64,1], index: 8, kind: input, shape index: {}]   ;;  %s1664_s9 = inlined_call_operand.vmem [shape: f32[64,1], index: 9, kind: input, shape index: {}]   ;;  %s1665_s3 = inlined_call_operand.vmem [shape: f32[64,64], index: 3, kind: input, shape index: {}]   ;;  %s1666_s5 = inlined_call_operand.vmem [shape: f32[64,64], index: 5, kind: input, shape index: {}]   ;;  %s1667_s7 = inlined_call_operand.vmem [shape: f32[64,64], index: 7, kind: input, shape index: {}]   ;;  %s1668_s12 = inlined_call_operand.vmem [shape: f32[32,1], index: 12, kind: output, shape index: {}]   ;;  %s1669_s11 = inlined_call_operand.vmem [shape: f32[32,256], index: 11, kind: input, shape index: {}]  }
   0x1   :  { %v59_v0 = vld [vmem:[%s1657_s0 + $0x38] sm:$0xff]  ;;  %v58_v1 = vld [vmem:[%s1657_s0 + $0x30] sm:$0xff]  ;;  %v57_v2 = vld [vmem:[%s1657_s0 + $0x28] sm:$0xff]  ;;  %205 = vmatprep.mubr.f32.mxu0 %v1180_v3  ;;  %1178 = vset.pattern.permute.xlu0 %v1181_v4  ;;  %v17_v5 = vstv %s1658_s10  ;;  %vm47_vm2 = vcmask 7168  }
   0x2   :  { %165 = vmatprep.subr.mxu0 %v59_v0  ;;  %v56_v6 = vld [vmem:[%s1657_s0 + $0x20] sm:$0xff]  ;;  %1179 = vset.pattern.permute.xlu1 %v1181_v4  ;;  %18 = vst [vmem:[#allocation2] sm:$0x1] %v17_v5  ;;  %v55_v7 = vld [vmem:[%s1657_s0 + $0x18] sm:$0xff]  ;;  %v54_v8 = vld [vmem:[%s1657_s0 + $0x10] sm:$0xff] }
   0x3   :  { %166 = vmatpush1.msra.mxu0 %v58_v1  ;;  %431 = vmatprep.mubr.f32.mxu1 %v1180_v3  ;;  %v53_v9 = vld [vmem:[%s1657_s0 + $0x8] sm:$0xff]  ;;  %v75_v10 = vld [vmem:[%s1659_s2 + $0x38] sm:$0xff]  ;;  %v52_v11 = vld [vmem:[%s1657_s0] sm:$0xff]  ;;  %49 = vst.msk [vmem:[%s1668_s12 + $0x8] sm:$0xff] %vm47_vm2, %v1180_v3 }
   0x4   :  { %167 = vmatprep.subr.mxu0 %v57_v2  ;;  %113 = vperm.xlu0 %1178, %v75_v10   ;;  %v73_v12 = vld [vmem:[%s1659_s2 + $0x28] sm:$0xff]  ;;  %v60_v13 = vld [vmem:[%s1660_s1] sm:$0xff]  ;;  %v74_v14 = vld [vmem:[%s1659_s2 + $0x30] sm:$0xff]  ;;  %48 = vst.msk [vmem:[%s1668_s12] sm:$0xff] %vm47_vm2, %v1180_v3 }
   0x5   :  { %168 = vmatpush1.msra.mxu0 %v56_v6  ;;  %103 = vperm.xlu1 %1179, %v73_v12   ;;  %v72_v15 = vld [vmem:[%s1659_s2 + $0x20] sm:$0xff]  ;;  %v61_v16 = vld [vmem:[%s1660_s1 + $0x8] sm:$0xff]  ;;  %v71_v17 = vld [vmem:[%s1659_s2 + $0x18] sm:$0xff]  ;;  %50 = vst.msk [vmem:[%s1668_s12 + $0x10] sm:$0xff] %vm47_vm2, %v1180_v3 }
   0x6   :  { %169 = vmatprep.subr.mxu0 %v55_v7  ;;  %v70_v18 = vld [vmem:[%s1659_s2 + $0x10] sm:$0xff]  ;;  %v69_v20 = vld [vmem:[%s1659_s2 + $0x8] sm:$0xff]  ;;  %v68_v21 = vld [vmem:[%s1659_s2] sm:$0xff]  ;;  %51 = vst.msk [vmem:[%s1668_s12 + $0x18] sm:$0xff] %vm47_vm2, %v1180_v3 }
   0x7   :  { %170 = vmatpush1.msra.mxu0 %v54_v8  ;;  %v62_v19 = vld [vmem:[%s1660_s1 + $0x10] sm:$0xff]  ;;  %v63_v22 = vld [vmem:[%s1660_s1 + $0x18] sm:$0xff]  ;;  %v64_v25 = vld [vmem:[%s1660_s1 + $0x20] sm:$0xff] }
   0x8   :  { %171 = vmatprep.subr.mxu0 %v53_v9  ;;  %108 = vperm.xlu0 %1178, %v74_v14   ;;  %v301_v23 = vld [vmem:[%s1661_s4 + $0x38] sm:$0xff]  ;;  %v300_v24 = vld [vmem:[%s1661_s4 + $0x30] sm:$0xff]  ;;  %v299_v26 = vld [vmem:[%s1661_s4 + $0x28] sm:$0xff] }
   0x9   :  { %172 = vmatpush1.msra.mxu0 %v52_v11  ;;  %98 = vperm.xlu1 %1179, %v72_v15   ;;  %v298_v27 = vld [vmem:[%s1661_s4 + $0x20] sm:$0xff]  ;;  %v65_v28 = vld [vmem:[%s1660_s1 + $0x28] sm:$0xff]  ;;  %v297_v29 = vld [vmem:[%s1661_s4 + $0x18] sm:$0xff] }
   0xa   :  { %1128 = vmatmul.mubr.msk.f32.vlgmr.msra.gmra.mxu0 %vm116_vm0, %v60_v13  ;;  %v296_v30 = vld [vmem:[%s1661_s4 + $0x10] sm:$0xff]  ;;  %v295_v32 = vld [vmem:[%s1661_s4 + $0x8] sm:$0xff]  ;;  %v294_v33 = vld [vmem:[%s1661_s4] sm:$0xff] }
   0xb   :  { %211 = vmatprep.mubr.f32.mxu0 %v1180_v3  ;;  %v66_v31 = vld [vmem:[%s1660_s1 + $0x30] sm:$0xff]  ;;  %v67_v34 = vld [vmem:[%s1660_s1 + $0x38] sm:$0xff]  ;;  %v525_v37 = vld [vmem:[%s1662_s6 + $0x28] sm:$0xff] }
   0xc   :  { %93 = vperm.xlu0 %1178, %v71_v17   ;;  %v527_v35 = vld [vmem:[%s1662_s6 + $0x38] sm:$0xff]  ;;  %v526_v36 = vld [vmem:[%s1662_s6 + $0x30] sm:$0xff]  ;;  %v524_v38 = vld [vmem:[%s1662_s6 + $0x20] sm:$0xff] }
   0xd   :  { %88 = vperm.xlu1 %1179, %v70_v18   ;;  %v523_v39 = vld [vmem:[%s1662_s6 + $0x18] sm:$0xff]  ;;  %v522_v40 = vld [vmem:[%s1662_s6 + $0x10] sm:$0xff]  ;;  %v521_v41 = vld [vmem:[%s1662_s6 + $0x8] sm:$0xff] }
   0xe   :  { %1129 = vmatmul.mubr.msk.f32.gmra.mxu0 %vm116_vm0, %v61_v16  ;;  %v520_v42 = vld [vmem:[%s1662_s6] sm:$0xff]  ;;  %v746_v44 = vld [vmem:[%s1663_s8 + $0x8] sm:$0xff]  ;;  %v747_v45 = vld [vmem:[%s1663_s8 + $0x10] sm:$0xff] }
   0xf   :  { %217 = vmatprep.mubr.f32.mxu0 %v1180_v3  ;;  %v745_v43 = vld [vmem:[%s1663_s8] sm:$0xff]  ;;  %v748_v46 = vld [vmem:[%s1663_s8 + $0x18] sm:$0xff]  ;;  %v963_v49 = vld [vmem:[%s1664_s9 + $0x8] sm:$0xff] }
  0x10   :  { %83 = vperm.xlu0 %1178, %v69_v20   ;;  %v749_v47 = vld [vmem:[%s1663_s8 + $0x20] sm:$0xff]  ;;  %v750_v50 = vld [vmem:[%s1663_s8 + $0x28] sm:$0xff]  ;;  %v964_v51 = vld [vmem:[%s1664_s9 + $0x10] sm:$0xff] }
  0x11   :  { %78 = vperm.xlu1 %1179, %v68_v21   ;;  %v962_v48 = vld [vmem:[%s1664_s9] sm:$0xff]  ;;  %v751_v52 = vld [vmem:[%s1663_s8 + $0x30] sm:$0xff]  ;;  %v965_v53 = vld [vmem:[%s1664_s9 + $0x18] sm:$0xff] }
  0x12   :  { %1130 = vmatmul.mubr.msk.f32.gmra.mxu0 %vm116_vm0, %v62_v19  ;;  %v752_v54 = vld [vmem:[%s1663_s8 + $0x38] sm:$0xff]  ;;  %v966_v55 = vld [vmem:[%s1664_s9 + $0x20] sm:$0xff]  ;;  %v967_v56 = vld [vmem:[%s1664_s9 + $0x28] sm:$0xff] }
  0x13   :  { %223 = vmatprep.mubr.f32.mxu0 %v1180_v3  ;;  %v968_v57 = vld [vmem:[%s1664_s9 + $0x30] sm:$0xff]  ;;  %v969_v58 = vld [vmem:[%s1664_s9 + $0x38] sm:$0xff]  ;;  %v1052_v59 = vld [vmem:[#allocation2] sm:$0x1] }
  0x14   :  { %339 = vperm.xlu0 %1178, %v301_v23  }
  0x15   :  { %334 = vperm.xlu1 %1179, %v300_v24  }
  0x16   :  { %1131 = vmatmul.mubr.msk.f32.gmra.mxu0 %vm116_vm0, %v63_v22 }
  0x17   :  { %229 = vmatprep.mubr.f32.mxu0 %v1180_v3 }
  0x18   :  { %329 = vperm.xlu0 %1178, %v299_v26  }
  0x19   :  { %324 = vperm.xlu1 %1179, %v298_v27  }
  0x1a   :  { %1132 = vmatmul.mubr.msk.f32.gmra.mxu0 %vm116_vm0, %v64_v25 }
  0x1b   :  { %235 = vmatprep.mubr.f32.mxu0 %v1180_v3 }
  0x1c   :  { %319 = vperm.xlu0 %1178, %v297_v29  }
  0x1d   :  { %314 = vperm.xlu1 %1179, %v296_v30  }
  0x1e   :  { %1133 = vmatmul.mubr.msk.f32.gmra.mxu0 %vm116_vm0, %v65_v28 }
  0x1f   :  { %241 = vmatprep.mubr.f32.mxu0 %v1180_v3 }
  0x20   :  { %309 = vperm.xlu0 %1178, %v295_v32  }
  0x21   :  { %304 = vperm.xlu1 %1179, %v294_v33  }
  0x22   :  { %1134 = vmatmul.mubr.msk.f32.gmra.mxu0 %vm116_vm0, %v66_v31 }
  0x23   :  { %247 = vmatprep.mubr.f32.mxu0 %v1180_v3 }
  0x24   :  { %565 = vperm.xlu0 %1178, %v527_v35  }
  0x25   :  { %560 = vperm.xlu1 %1179, %v526_v36  }
  0x26   :  { %1135 = vmatmul.mubr.msk.f32.gmra.mxu0 %vm116_vm0, %v67_v34 }
  0x27   :  { %656 = vmatprep.mubr.f32.mxu0 %v1180_v3 }
  0x28   :  { %555 = vperm.xlu0 %1178, %v525_v37  }
  0x29   :  { %550 = vperm.xlu1 %1179, %v524_v38  }
  0x2c   :  { %545 = vperm.xlu0 %1178, %v523_v39  }
  0x2d   :  { %540 = vperm.xlu1 %1179, %v522_v40  }
  0x30   :  { %535 = vperm.xlu0 %1178, %v521_v41  }
  0x31   :  { %530 = vperm.xlu1 %1179, %v520_v42  }
  0x34   :  { %755 = vperm.xlu0 %1178, %v745_v43  }
  0x35   :  { %760 = vperm.xlu1 %1179, %v746_v44  }
  0x38   :  { %765 = vperm.xlu0 %1178, %v747_v45  }
  0x39   :  { %770 = vperm.xlu1 %1179, %v748_v46  }
  0x3c   :  { %775 = vperm.xlu0 %1178, %v749_v47  }
  0x3d   :  { %972 = vperm.xlu1 %1179, %v962_v48  }
  0x40   :  { %977 = vperm.xlu0 %1178, %v963_v49  }
  0x41   :  { %780 = vperm.xlu1 %1179, %v750_v50  }
  0x44   :  { %982 = vperm.xlu0 %1178, %v964_v51  }
  0x45   :  { %785 = vperm.xlu1 %1179, %v751_v52  }
  0x48   :  { %987 = vperm.xlu0 %1178, %v965_v53  }
  0x49   :  { %790 = vperm.xlu1 %1179, %v752_v54  }
  0x4c   :  { %992 = vperm.xlu0 %1178, %v966_v55  }
  0x4d   :  { %997 = vperm.xlu1 %1179, %v967_v56  }
  0x50   :  { %1002 = vperm.xlu0 %1178, %v968_v57  }
  0x51   :  { %1007 = vperm.xlu1 %1179, %v969_v58  }
  0x54   :  { %1055 = vperm.xlu0 %1178, %v1052_v59  }
  0x7f   :  { %v114_v7 = vpop.permute.xlu0 %113 }
  0x80   :  { %v104_v9 = vpop.permute.xlu1 %103 }
  0x83   :  { %v109_v12 = vpop.permute.xlu0 %108 }
  0x84   :  { %v99_v14 = vpop.permute.xlu1 %98 }
  0x87   :  { %v94_v22 = vpop.permute.xlu0 %93 }
  0x88   :  { %v89_v28 = vpop.permute.xlu1 %88 }
  0x8b   :  { %v84_v40 = vpop.permute.xlu0 %83 }
  0x8c   :  { %v79_v47 = vpop.permute.xlu1 %78 }
  0xca   :  { %v207_v60 = vpop.f32.mrf.mxu0 }
  0xcb   :  { %v208_v54 = vadd.f32 %v207_v60, %v79_v47 }
  0xcc   :  { %v209_v61 = vpop.f32.mrf.mxu0 }
  0xcd   :  { %v210_v51 = vadd.f32 %v209_v61, %v79_v47 }
  0xce   :  { %v213_v62 = vpop.f32.mrf.mxu0 }
  0xcf   :  { %v214_v48 = vadd.f32 %v213_v62, %v84_v40  ;;  %v254_v62 = vmul.f32 0.01, %v208_v54 }
  0xd0   :  { %v215_v63 = vpop.f32.mrf.mxu0 }
  0xd1   :  { %v216_v44 = vadd.f32 %v215_v63, %v84_v40  ;;  %v256_v59 = vmul.f32 0.01, %v214_v48 }
  0xd2   :  { %v219_v0 = vpop.f32.mrf.mxu0 }
  0xd3   :  { %v220_v41 = vadd.f32 %v219_v0, %v89_v28  ;;  %v257_v57 = vmul.f32 0.01, %v216_v44  ;;  %v255_v0 = vmul.f32 0.01, %v210_v51 }
  0xd4   :  { %v221_v1 = vpop.f32.mrf.mxu0 }
  0xd5   :  { %v222_v37 = vadd.f32 %v221_v1, %v89_v28  ;;  %v258_v55 = vmul.f32 0.01, %v220_v41  ;;  %v273_v61 = vmax.f32 %v216_v44, %v257_v57  ;;  %v271_v60 = vmax.f32 %v210_v51, %v255_v0 }
  0xd6   :  { %v225_v2 = vpop.f32.mrf.mxu0 }
  0xd7   :  { %v226_v34 = vadd.f32 %v225_v2, %v94_v22  ;;  %v259_v52 = vmul.f32 0.01, %v222_v37  ;;  %v274_v2 = vmax.f32 %v220_v41, %v258_v55 }
  0xd8   :  { %v227_v4 = vpop.f32.mrf.mxu0 }
  0xd9   :  { %v228_v31 = vadd.f32 %v227_v4, %v94_v22  ;;  %v260_v49 = vmul.f32 0.01, %v226_v34  ;;  %v275_v1 = vmax.f32 %v222_v37, %v259_v52  ;;  %v272_v4 = vmax.f32 %v214_v48, %v256_v59 }
  0xda   :  { %v231_v5 = vpop.f32.mrf.mxu0 }
  0xdb   :  { %v232_v29 = vadd.f32 %v231_v5, %v99_v14  ;;  %v261_v45 = vmul.f32 0.01, %v228_v31  ;;  %v276_v63 = vmax.f32 %v226_v34, %v260_v49  ;;  %v270_v5 = vmax.f32 %v208_v54, %v254_v62 }
  0xdc   :  { %v233_v6 = vpop.f32.mrf.mxu0 }
  0xdd   :  { %v234_v25 = vadd.f32 %v233_v6, %v99_v14  ;;  %v262_v42 = vmul.f32 0.01, %v232_v29  ;;  %v277_v58 = vmax.f32 %v228_v31, %v261_v45  ;;  %v286_v6 = vld [vmem:[%s1665_s3] sm:$0xff] }
  0xde   :  { %v237_v8 = vpop.f32.mrf.mxu0 }
  0xdf   :  { %v238_v23 = vadd.f32 %v237_v8, %v104_v9  ;;  %v263_v38 = vmul.f32 0.01, %v234_v25  ;;  %v278_v56 = vmax.f32 %v232_v29, %v262_v42  ;;  %v288_v8 = vld [vmem:[%s1665_s3 + $0x10] sm:$0xff] }
  0xe0   :  { %v239_v10 = vpop.f32.mrf.mxu0 }
  0xe1   :  { %v240_v20 = vadd.f32 %v239_v10, %v104_v9  ;;  %v264_v35 = vmul.f32 0.01, %v238_v23  ;;  %v279_v53 = vmax.f32 %v234_v25, %v263_v38  ;;  %v289_v9 = vld [vmem:[%s1665_s3 + $0x18] sm:$0xff]  ;;  %v290_v10 = vld [vmem:[%s1665_s3 + $0x20] sm:$0xff] }
  0xe2   :  { %v243_v11 = vpop.f32.mrf.mxu0 }
  0xe3   :  { %v244_v18 = vadd.f32 %v243_v11, %v109_v12  ;;  %v265_v32 = vmul.f32 0.01, %v240_v20  ;;  %v280_v50 = vmax.f32 %v238_v23, %v264_v35  ;;  %v291_v11 = vld [vmem:[%s1665_s3 + $0x28] sm:$0xff] }
  0xe4   :  { %v245_v13 = vpop.f32.mrf.mxu0 }
  0xe5   :  { %v246_v16 = vadd.f32 %v245_v13, %v109_v12  ;;  %v266_v30 = vmul.f32 0.01, %v244_v18  ;;  %v281_v46 = vmax.f32 %v240_v20, %v265_v32  ;;  %v292_v12 = vld [vmem:[%s1665_s3 + $0x30] sm:$0xff]  ;;  %v293_v13 = vld [vmem:[%s1665_s3 + $0x38] sm:$0xff] }
  0xe6   :  { %v249_v15 = vpop.f32.mrf.mxu0 }
  0xe7   :  { %v250_v17 = vadd.f32 %v249_v15, %v114_v7  ;;  %v267_v26 = vmul.f32 0.01, %v246_v16  ;;  %v282_v43 = vmax.f32 %v244_v18, %v266_v30 }
  0xe8   :  { %v251_v19 = vpop.f32.mrf.mxu0 }
  0xe9   :  { %v252_v21 = vadd.f32 %v251_v19, %v114_v7  ;;  %v268_v24 = vmul.f32 0.01, %v250_v17  ;;  %v283_v39 = vmax.f32 %v246_v16, %v267_v26  ;;  %v287_v7 = vld [vmem:[%s1665_s3 + $0x8] sm:$0xff]  ;;  %v335_v26 = vpop.permute.xlu1 %334 }
  0xeb   :  { %v269_v27 = vmul.f32 0.01, %v252_v21  ;;  %v284_v36 = vmax.f32 %v250_v17, %v268_v24  ;;  %v340_v24 = vpop.permute.xlu0 %339 }
  0xed   :  { %v285_v33 = vmax.f32 %v252_v21, %v269_v27  ;;  %v325_v31 = vpop.permute.xlu1 %324 }
  0xef   :  { %383 = vmatprep.subr.mxu1 %v285_v33  ;;  %v330_v29 = vpop.permute.xlu0 %329 }
  0xf0   :  { %384 = vmatpush1.msra.mxu1 %v284_v36 }
  0xf1   :  { %385 = vmatprep.subr.mxu1 %v283_v39  ;;  %v315_v45 = vpop.permute.xlu1 %314 }
  0xf2   :  { %386 = vmatpush1.msra.mxu1 %v282_v43 }
  0xf3   :  { %387 = vmatprep.subr.mxu1 %v281_v46  ;;  %v320_v39 = vpop.permute.xlu0 %319 }
  0xf4   :  { %388 = vmatpush1.msra.mxu1 %v280_v50 }
  0xf5   :  { %389 = vmatprep.subr.mxu1 %v279_v53 }
  0xf6   :  { %390 = vmatpush1.msra.mxu1 %v278_v56 }
  0xf7   :  { %391 = vmatprep.subr.mxu1 %v277_v58  ;;  %v310_v57 = vpop.permute.xlu0 %309 }
  0xf8   :  { %392 = vmatpush1.msra.mxu1 %v276_v63 }
  0xf9   :  { %393 = vmatprep.subr.mxu1 %v275_v1 }
  0xfa   :  { %394 = vmatpush1.msra.mxu1 %v274_v2  ;;  %v305_v2 = vpop.permute.xlu1 %304 }
  0xfb   :  { %395 = vmatprep.subr.mxu1 %v273_v61 }
  0xfc   :  { %396 = vmatpush1.msra.mxu1 %v272_v4 }
  0xfd   :  { %397 = vmatprep.subr.mxu1 %v271_v60 }
  0xfe   :  { %398 = vmatpush1.msra.mxu1 %v270_v5 }
  0xff   :  { %1136 = vmatmul.mubr.msk.f32.vlgmr.msra.gmra.mxu1 %vm342_vm1, %v286_v6 }
 0x100   :  { %437 = vmatprep.mubr.f32.mxu1 %v1180_v3 }
 0x103   :  { %1137 = vmatmul.mubr.msk.f32.gmra.mxu1 %vm342_vm1, %v287_v7 }
 0x104   :  { %443 = vmatprep.mubr.f32.mxu1 %v1180_v3 }
 0x107   :  { %1138 = vmatmul.mubr.msk.f32.gmra.mxu1 %vm342_vm1, %v288_v8 }
 0x108   :  { %449 = vmatprep.mubr.f32.mxu1 %v1180_v3 }
 0x10b   :  { %1139 = vmatmul.mubr.msk.f32.gmra.mxu1 %vm342_vm1, %v289_v9 }
 0x10c   :  { %455 = vmatprep.mubr.f32.mxu1 %v1180_v3 }
 0x10f   :  { %1140 = vmatmul.mubr.msk.f32.gmra.mxu1 %vm342_vm1, %v290_v10 }
 0x110   :  { %461 = vmatprep.mubr.f32.mxu1 %v1180_v3 }
 0x113   :  { %1141 = vmatmul.mubr.msk.f32.gmra.mxu1 %vm342_vm1, %v291_v11 }
 0x114   :  { %467 = vmatprep.mubr.f32.mxu1 %v1180_v3 }
 0x117   :  { %1142 = vmatmul.mubr.msk.f32.gmra.mxu1 %vm342_vm1, %v292_v12 }
 0x118   :  { %473 = vmatprep.mubr.f32.mxu1 %v1180_v3 }
 0x11b   :  { %1143 = vmatmul.mubr.msk.f32.gmra.mxu1 %vm342_vm1, %v293_v13 }
 0x11c   :  { %887 = vmatprep.mubr.f32.mxu1 %v1180_v3 }
 0x1bf   :  { %v433_v14 = vpop.f32.mrf.mxu1 }
 0x1c0   :  { %v434_v8 = vadd.f32 %v433_v14, %v305_v2 }
 0x1c1   :  { %v435_v15 = vpop.f32.mrf.mxu1 }
 0x1c2   :  { %v436_v5 = vadd.f32 %v435_v15, %v305_v2 }
 0x1c3   :  { %v439_v16 = vpop.f32.mrf.mxu1 }
 0x1c4   :  { %v440_v61 = vadd.f32 %v439_v16, %v310_v57  ;;  %v480_v16 = vmul.f32 0.01, %v434_v8 }
 0x1c5   :  { %v441_v17 = vpop.f32.mrf.mxu1 }
 0x1c6   :  { %v442_v0 = vadd.f32 %v441_v17, %v310_v57  ;;  %v482_v13 = vmul.f32 0.01, %v440_v61 }
 0x1c7   :  { %v445_v18 = vpop.f32.mrf.mxu1 }
 0x1c8   :  { %v446_v58 = vadd.f32 %v445_v18, %v315_v45  ;;  %v483_v11 = vmul.f32 0.01, %v442_v0  ;;  %v481_v18 = vmul.f32 0.01, %v436_v5 }
 0x1c9   :  { %v447_v19 = vpop.f32.mrf.mxu1 }
 0x1ca   :  { %v448_v54 = vadd.f32 %v447_v19, %v315_v45  ;;  %v484_v9 = vmul.f32 0.01, %v446_v58  ;;  %v499_v15 = vmax.f32 %v442_v0, %v483_v11  ;;  %v497_v14 = vmax.f32 %v436_v5, %v481_v18 }
 0x1cb   :  { %v451_v20 = vpop.f32.mrf.mxu1 }
 0x1cc   :  { %v452_v51 = vadd.f32 %v451_v20, %v320_v39  ;;  %v485_v6 = vmul.f32 0.01, %v448_v54  ;;  %v500_v20 = vmax.f32 %v446_v58, %v484_v9 }
 0x1cd   :  { %v453_v21 = vpop.f32.mrf.mxu1 }
 0x1ce   :  { %v454_v48 = vadd.f32 %v453_v21, %v320_v39  ;;  %v486_v4 = vmul.f32 0.01, %v452_v51  ;;  %v501_v19 = vmax.f32 %v448_v54, %v485_v6  ;;  %v498_v21 = vmax.f32 %v440_v61, %v482_v13 }
 0x1cf   :  { %v457_v22 = vpop.f32.mrf.mxu1 }
 0x1d0   :  { %v458_v46 = vadd.f32 %v457_v22, %v325_v31  ;;  %v487_v1 = vmul.f32 0.01, %v454_v48  ;;  %v502_v17 = vmax.f32 %v452_v51, %v486_v4  ;;  %v496_v22 = vmax.f32 %v434_v8, %v480_v16 }
 0x1d1   :  { %v459_v23 = vpop.f32.mrf.mxu1 }
 0x1d2   :  { %v460_v42 = vadd.f32 %v459_v23, %v325_v31  ;;  %v488_v59 = vmul.f32 0.01, %v458_v46  ;;  %v503_v12 = vmax.f32 %v454_v48, %v487_v1  ;;  %v512_v23 = vld [vmem:[%s1666_s5] sm:$0xff] }
 0x1d3   :  { %v463_v25 = vpop.f32.mrf.mxu1 }
 0x1d4   :  { %v464_v40 = vadd.f32 %v463_v25, %v330_v29  ;;  %v489_v55 = vmul.f32 0.01, %v460_v42  ;;  %v504_v10 = vmax.f32 %v458_v46, %v488_v59  ;;  %v514_v25 = vld [vmem:[%s1666_s5 + $0x10] sm:$0xff] }
 0x1d5   :  { %v465_v27 = vpop.f32.mrf.mxu1 }
 0x1d6   :  { %v466_v37 = vadd.f32 %v465_v27, %v330_v29  ;;  %v490_v52 = vmul.f32 0.01, %v464_v40  ;;  %v505_v7 = vmax.f32 %v460_v42, %v489_v55  ;;  %v516_v27 = vld [vmem:[%s1666_s5 + $0x20] sm:$0xff]  ;;  %v518_v29 = vld [vmem:[%s1666_s5 + $0x30] sm:$0xff] }
 0x1d7   :  { %v469_v28 = vpop.f32.mrf.mxu1 }
 0x1d8   :  { %v470_v35 = vadd.f32 %v469_v28, %v335_v26  ;;  %v491_v49 = vmul.f32 0.01, %v466_v37  ;;  %v506_v60 = vmax.f32 %v464_v40, %v490_v52  ;;  %v517_v28 = vld [vmem:[%s1666_s5 + $0x28] sm:$0xff] }
 0x1d9   :  { %v471_v30 = vpop.f32.mrf.mxu1 }
 0x1da   :  { %v472_v33 = vadd.f32 %v471_v30, %v335_v26  ;;  %v492_v47 = vmul.f32 0.01, %v470_v35  ;;  %v507_v62 = vmax.f32 %v466_v37, %v491_v49  ;;  %v515_v26 = vld [vmem:[%s1666_s5 + $0x18] sm:$0xff] }
 0x1db   :  { %v475_v32 = vpop.f32.mrf.mxu1  ;;  %v519_v30 = vld [vmem:[%s1666_s5 + $0x38] sm:$0xff] }
 0x1dc   :  { %v476_v34 = vadd.f32 %v475_v32, %v340_v24  ;;  %v493_v43 = vmul.f32 0.01, %v472_v33  ;;  %v508_v63 = vmax.f32 %v470_v35, %v492_v47 }
 0x1dd   :  { %v477_v36 = vpop.f32.mrf.mxu1 }
 0x1de   :  { %v478_v38 = vadd.f32 %v477_v36, %v340_v24  ;;  %v494_v41 = vmul.f32 0.01, %v476_v34  ;;  %v509_v56 = vmax.f32 %v472_v33, %v493_v43  ;;  %v513_v24 = vld [vmem:[%s1666_s5 + $0x8] sm:$0xff]  ;;  %v561_v43 = vpop.permute.xlu1 %560 }
 0x1e0   :  { %v495_v44 = vmul.f32 0.01, %v478_v38  ;;  %v510_v53 = vmax.f32 %v476_v34, %v494_v41  ;;  %v566_v41 = vpop.permute.xlu0 %565 }
 0x1e2   :  { %v511_v50 = vmax.f32 %v478_v38, %v495_v44  ;;  %v551_v48 = vpop.permute.xlu1 %550 }
 0x1e4   :  { %608 = vmatprep.subr.mxu0 %v511_v50  ;;  %v556_v46 = vpop.permute.xlu0 %555 }
 0x1e5   :  { %609 = vmatpush1.msra.mxu0 %v510_v53 }
 0x1e6   :  { %610 = vmatprep.subr.mxu0 %v509_v56  ;;  %v541_v1 = vpop.permute.xlu1 %540 }
 0x1e7   :  { %611 = vmatpush1.msra.mxu0 %v508_v63 }
 0x1e8   :  { %612 = vmatprep.subr.mxu0 %v507_v62  ;;  %v546_v56 = vpop.permute.xlu0 %545 }
 0x1e9   :  { %613 = vmatpush1.msra.mxu0 %v506_v60 }
 0x1ea   :  { %614 = vmatprep.subr.mxu0 %v505_v7 }
 0x1eb   :  { %615 = vmatpush1.msra.mxu0 %v504_v10 }
 0x1ec   :  { %616 = vmatprep.subr.mxu0 %v503_v12  ;;  %v536_v11 = vpop.permute.xlu0 %535 }
 0x1ed   :  { %617 = vmatpush1.msra.mxu0 %v502_v17 }
 0x1ee   :  { %618 = vmatprep.subr.mxu0 %v501_v19 }
 0x1ef   :  { %619 = vmatpush1.msra.mxu0 %v500_v20  ;;  %v531_v20 = vpop.permute.xlu1 %530 }
 0x1f0   :  { %620 = vmatprep.subr.mxu0 %v499_v15 }
 0x1f1   :  { %621 = vmatpush1.msra.mxu0 %v498_v21 }
 0x1f2   :  { %622 = vmatprep.subr.mxu0 %v497_v14 }
 0x1f3   :  { %623 = vmatpush1.msra.mxu0 %v496_v22 }
 0x1f4   :  { %1144 = vmatmul.mubr.msk.f32.vlgmr.msra.gmra.mxu0 %vm342_vm1, %v512_v23 }
 0x1f5   :  { %662 = vmatprep.mubr.f32.mxu0 %v1180_v3 }
 0x1f8   :  { %1145 = vmatmul.mubr.msk.f32.gmra.mxu0 %vm342_vm1, %v513_v24 }
 0x1f9   :  { %668 = vmatprep.mubr.f32.mxu0 %v1180_v3 }
 0x1fc   :  { %1146 = vmatmul.mubr.msk.f32.gmra.mxu0 %vm342_vm1, %v514_v25 }
 0x1fd   :  { %674 = vmatprep.mubr.f32.mxu0 %v1180_v3 }
 0x200   :  { %1147 = vmatmul.mubr.msk.f32.gmra.mxu0 %vm342_vm1, %v515_v26 }
 0x201   :  { %680 = vmatprep.mubr.f32.mxu0 %v1180_v3 }
 0x204   :  { %1148 = vmatmul.mubr.msk.f32.gmra.mxu0 %vm342_vm1, %v516_v27 }
 0x205   :  { %686 = vmatprep.mubr.f32.mxu0 %v1180_v3 }
 0x208   :  { %1149 = vmatmul.mubr.msk.f32.gmra.mxu0 %vm342_vm1, %v517_v28 }
 0x209   :  { %692 = vmatprep.mubr.f32.mxu0 %v1180_v3 }
 0x20c   :  { %1150 = vmatmul.mubr.msk.f32.gmra.mxu0 %vm342_vm1, %v518_v29 }
 0x20d   :  { %698 = vmatprep.mubr.f32.mxu0 %v1180_v3 }
 0x210   :  { %1151 = vmatmul.mubr.msk.f32.gmra.mxu0 %vm342_vm1, %v519_v30 }
 0x211   :  { %881 = vmatprep.mubr.f32.mxu0 %v1180_v3 }
 0x2b4   :  { %v1516_v31 = vpop.f32.mrf.mxu0 }
 0x2b5   :  { %v659_v25 = vadd.f32 %v1516_v31, %v531_v20 }
 0x2b6   :  { %v660_v32 = vpop.f32.mrf.mxu0 }
 0x2b7   :  { %v661_v22 = vadd.f32 %v660_v32, %v531_v20 }
 0x2b8   :  { %v664_v33 = vpop.f32.mrf.mxu0 }
 0x2b9   :  { %v665_v15 = vadd.f32 %v664_v33, %v536_v11 }
 0x2ba   :  { %v666_v34 = vpop.f32.mrf.mxu0 }
 0x2bb   :  { %v667_v18 = vadd.f32 %v666_v34, %v536_v11  ;;  %v707_v30 = vmul.f32 0.01, %v665_v15  ;;  %v706_v34 = vmul.f32 0.01, %v661_v22 }
 0x2bc   :  { %v670_v35 = vpop.f32.mrf.mxu0 }
 0x2bd   :  { %v671_v12 = vadd.f32 %v670_v35, %v541_v1  ;;  %v708_v28 = vmul.f32 0.01, %v667_v18  ;;  %v705_v35 = vmul.f32 0.01, %v659_v25 }
 0x2be   :  { %v672_v36 = vpop.f32.mrf.mxu0 }
 0x2bf   :  { %v673_v8 = vadd.f32 %v672_v36, %v541_v1  ;;  %v709_v26 = vmul.f32 0.01, %v671_v12  ;;  %v724_v31 = vmax.f32 %v667_v18, %v708_v28 }
 0x2c0   :  { %v676_v37 = vpop.f32.mrf.mxu0 }
 0x2c1   :  { %v677_v5 = vadd.f32 %v676_v37, %v546_v56  ;;  %v710_v23 = vmul.f32 0.01, %v673_v8  ;;  %v725_v36 = vmax.f32 %v671_v12, %v709_v26  ;;  %v723_v37 = vmax.f32 %v665_v15, %v707_v30 }
 0x2c2   :  { %v678_v38 = vpop.f32.mrf.mxu0 }
 0x2c3   :  { %v679_v61 = vadd.f32 %v678_v38, %v546_v56  ;;  %v711_v21 = vmul.f32 0.01, %v677_v5  ;;  %v726_v32 = vmax.f32 %v673_v8, %v710_v23  ;;  %v722_v38 = vmax.f32 %v661_v22, %v706_v34 }
 0x2c4   :  { %v682_v39 = vpop.f32.mrf.mxu0 }
 0x2c5   :  { %v683_v62 = vadd.f32 %v682_v39, %v551_v48  ;;  %v712_v19 = vmul.f32 0.01, %v679_v61  ;;  %v727_v33 = vmax.f32 %v677_v5, %v711_v21  ;;  %v721_v39 = vmax.f32 %v659_v25, %v705_v35 }
 0x2c6   :  { %v684_v40 = vpop.f32.mrf.mxu0 }
 0x2c7   :  { %v685_v59 = vadd.f32 %v684_v40, %v551_v48  ;;  %v713_v13 = vmul.f32 0.01, %v683_v62  ;;  %v728_v29 = vmax.f32 %v679_v61, %v712_v19  ;;  %v737_v40 = vld [vmem:[%s1667_s7] sm:$0xff]  ;;  %v756_v48 = vpop.permute.xlu0 %755 }
 0x2c8   :  { %v688_v42 = vpop.f32.mrf.mxu0 }
 0x2c9   :  { %v689_v57 = vadd.f32 %v688_v42, %v556_v46  ;;  %v714_v9 = vmul.f32 0.01, %v685_v59  ;;  %v729_v27 = vmax.f32 %v683_v62, %v713_v13  ;;  %v739_v42 = vld [vmem:[%s1667_s7 + $0x10] sm:$0xff] }
 0x2ca   :  { %v690_v44 = vpop.f32.mrf.mxu0 }
 0x2cb   :  { %v691_v54 = vadd.f32 %v690_v44, %v556_v46  ;;  %v715_v6 = vmul.f32 0.01, %v689_v57  ;;  %v730_v24 = vmax.f32 %v685_v59, %v714_v9  ;;  %v741_v44 = vld [vmem:[%s1667_s7 + $0x20] sm:$0xff]  ;;  %v743_v46 = vld [vmem:[%s1667_s7 + $0x30] sm:$0xff] }
 0x2cc   :  { %v694_v45 = vpop.f32.mrf.mxu0 }
 0x2cd   :  { %v695_v52 = vadd.f32 %v694_v45, %v561_v43  ;;  %v716_v4 = vmul.f32 0.01, %v691_v54  ;;  %v731_v14 = vmax.f32 %v689_v57, %v715_v6  ;;  %v742_v45 = vld [vmem:[%s1667_s7 + $0x28] sm:$0xff] }
 0x2ce   :  { %v696_v47 = vpop.f32.mrf.mxu0 }
 0x2cf   :  { %v697_v50 = vadd.f32 %v696_v47, %v561_v43  ;;  %v717_v2 = vmul.f32 0.01, %v695_v52  ;;  %v732_v16 = vmax.f32 %v691_v54, %v716_v4  ;;  %v740_v43 = vld [vmem:[%s1667_s7 + $0x18] sm:$0xff] }
 0x2d0   :  { %v700_v49 = vpop.f32.mrf.mxu0  ;;  %v744_v47 = vld [vmem:[%s1667_s7 + $0x38] sm:$0xff] }
 0x2d1   :  { %v701_v51 = vadd.f32 %v700_v49, %v566_v41  ;;  %v718_v63 = vmul.f32 0.01, %v697_v50  ;;  %v733_v17 = vmax.f32 %v695_v52, %v717_v2  ;;  %v761_v49 = vpop.permute.xlu1 %760 }
 0x2d2   :  { %v702_v53 = vpop.f32.mrf.mxu0 }
 0x2d3   :  { %v703_v55 = vadd.f32 %v702_v53, %v566_v41  ;;  %v719_v58 = vmul.f32 0.01, %v701_v51  ;;  %v734_v10 = vmax.f32 %v697_v50, %v718_v63  ;;  %v738_v41 = vld [vmem:[%s1667_s7 + $0x8] sm:$0xff]  ;;  %v766_v50 = vpop.permute.xlu0 %765 }
 0x2d5   :  { %v720_v0 = vmul.f32 0.01, %v703_v55  ;;  %v735_v7 = vmax.f32 %v701_v51, %v719_v58  ;;  %v771_v51 = vpop.permute.xlu1 %770 }
 0x2d7   :  { %v736_v60 = vmax.f32 %v703_v55, %v720_v0  ;;  %v776_v52 = vpop.permute.xlu0 %775 }
 0x2d9   :  { %833 = vmatprep.subr.mxu0 %v736_v60  ;;  %1160 = vmatprep.subr.mxu1 %v736_v60  ;;  %v973_v53 = vpop.permute.xlu1 %972 }
 0x2da   :  { %834 = vmatpush1.msra.mxu0 %v735_v7  ;;  %1168 = vmatpush1.msra.mxu1 %v735_v7 }
 0x2db   :  { %835 = vmatprep.subr.mxu0 %v734_v10  ;;  %1161 = vmatprep.subr.mxu1 %v734_v10  ;;  %v978_v56 = vpop.permute.xlu0 %977 }
 0x2dc   :  { %836 = vmatpush1.msra.mxu0 %v733_v17  ;;  %1169 = vmatpush1.msra.mxu1 %v733_v17 }
 0x2dd   :  { %837 = vmatprep.subr.mxu0 %v732_v16  ;;  %1162 = vmatprep.subr.mxu1 %v732_v16  ;;  %v781_v1 = vpop.permute.xlu1 %780 }
 0x2de   :  { %838 = vmatpush1.msra.mxu0 %v731_v14  ;;  %1170 = vmatpush1.msra.mxu1 %v731_v14 }
 0x2df   :  { %839 = vmatprep.subr.mxu0 %v730_v24  ;;  %1163 = vmatprep.subr.mxu1 %v730_v24  ;;  %v983_v60 = vpop.permute.xlu0 %982 }
 0x2e0   :  { %840 = vmatpush1.msra.mxu0 %v729_v27  ;;  %1171 = vmatpush1.msra.mxu1 %v729_v27 }
 0x2e1   :  { %841 = vmatprep.subr.mxu0 %v728_v29  ;;  %1164 = vmatprep.subr.mxu1 %v728_v29  ;;  %v786_v17 = vpop.permute.xlu1 %785 }
 0x2e2   :  { %842 = vmatpush1.msra.mxu0 %v727_v33  ;;  %1172 = vmatpush1.msra.mxu1 %v727_v33 }
 0x2e3   :  { %843 = vmatprep.subr.mxu0 %v726_v32  ;;  %1165 = vmatprep.subr.mxu1 %v726_v32  ;;  %v988_v21 = vpop.permute.xlu0 %987 }
 0x2e4   :  { %844 = vmatpush1.msra.mxu0 %v725_v36  ;;  %1173 = vmatpush1.msra.mxu1 %v725_v36 }
 0x2e5   :  { %845 = vmatprep.subr.mxu0 %v724_v31  ;;  %1166 = vmatprep.subr.mxu1 %v724_v31  ;;  %v791_v32 = vpop.permute.xlu1 %790 }
 0x2e6   :  { %846 = vmatpush1.msra.mxu0 %v723_v37  ;;  %1174 = vmatpush1.msra.mxu1 %v723_v37 }
 0x2e7   :  { %847 = vmatprep.subr.mxu0 %v722_v38  ;;  %1167 = vmatprep.subr.mxu1 %v722_v38 }
 0x2e8   :  { %848 = vmatpush1.msra.mxu0 %v721_v39  ;;  %1175 = vmatpush1.msra.mxu1 %v721_v39 }
 0x2e9   :  { %1152 = vmatmul.mubr.msk.f32.vlgmr.msra.gmra.mxu0 %vm342_vm1, %v737_v40  ;;  %1153 = vmatmul.mubr.msk.f32.vlgmr.msra.gmra.mxu1 %vm342_vm1, %v738_v41 }
 0x2ea   :  { %893 = vmatprep.mubr.f32.mxu1 %v1180_v3 }
 0x2ed   :  { %1154 = vmatmul.mubr.msk.f32.gmra.mxu1 %vm342_vm1, %v739_v42 }
 0x2ee   :  { %899 = vmatprep.mubr.f32.mxu1 %v1180_v3 }
 0x2f1   :  { %1155 = vmatmul.mubr.msk.f32.gmra.mxu1 %vm342_vm1, %v740_v43  ;;  %v993_v43 = vpop.permute.xlu0 %992 }
 0x2f2   :  { %905 = vmatprep.mubr.f32.mxu1 %v1180_v3 }
 0x2f5   :  { %1156 = vmatmul.mubr.msk.f32.gmra.mxu1 %vm342_vm1, %v741_v44 }
 0x2f6   :  { %911 = vmatprep.mubr.f32.mxu1 %v1180_v3 }
 0x2f9   :  { %1157 = vmatmul.mubr.msk.f32.gmra.mxu1 %vm342_vm1, %v742_v45 }
 0x2fa   :  { %917 = vmatprep.mubr.f32.mxu1 %v1180_v3 }
 0x2fd   :  { %1158 = vmatmul.mubr.msk.f32.gmra.mxu1 %vm342_vm1, %v743_v46 }
 0x2fe   :  { %923 = vmatprep.mubr.f32.mxu1 %v1180_v3 }
 0x301   :  { %1159 = vmatmul.mubr.msk.f32.gmra.mxu1 %vm342_vm1, %v744_v47 }
 0x3a9   :  { %v883_v54 = vpop.f32.mrf.mxu0  ;;  %v889_v55 = vpop.f32.mrf.mxu1 }
 0x3aa   :  { %v884_v57 = vadd.f32 %v883_v54, %v756_v48  ;;  %v890_v59 = vadd.f32 %v889_v55, %v761_v49 }
 0x3ab   :  { %v891_v58 = vpop.f32.mrf.mxu1  ;;  %v885_v63 = vpop.f32.mrf.mxu0 }
 0x3ac   :  { %v930_v62 = vmul.f32 0.01, %v884_v57  ;;  %v932_v4 = vmul.f32 0.01, %v890_v59  ;;  %v886_v3 = vadd.f32 %v885_v63, %v756_v48  ;;  %v892_v5 = vadd.f32 %v891_v58, %v761_v49 }
 0x3ad   :  { %v895_v0 = vpop.f32.mrf.mxu1 }
 0x3ae   :  { %v896_v2 = vadd.f32 %v895_v0, %v766_v50  ;;  %v946_v8 = vmax.f32 %v884_v57, %v930_v62  ;;  %v948_v12 = vmax.f32 %v890_v59, %v932_v4  ;;  %v931_v13 = vmul.f32 0.01, %v886_v3  ;;  %v998_v0 = vpop.permute.xlu1 %997 }
 0x3af   :  { %v897_v61 = vpop.f32.mrf.mxu1  ;;  %v933_v18 = vmul.f32 0.01, %v892_v5 }
 0x3b0   :  { %v934_v9 = vmul.f32 0.01, %v896_v2  ;;  %v898_v10 = vadd.f32 %v897_v61, %v766_v50  ;;  %v1010_v14 = vmul.f32 %v973_v53, %v946_v8  ;;  %v1012_v25 = vmul.f32 %v978_v56, %v948_v12 }
 0x3b1   :  { %v901_v6 = vpop.f32.mrf.mxu1  ;;  %v947_v26 = vmax.f32 %v886_v3, %v931_v13  ;;  %v949_v29 = vmax.f32 %v892_v5, %v933_v18 }
 0x3b2   :  { %v902_v7 = vadd.f32 %v901_v6, %v771_v51  ;;  %v950_v22 = vmax.f32 %v896_v2, %v934_v9  ;;  %v935_v23 = vmul.f32 0.01, %v898_v10  ;;  %v1026_v39 = vadd.f32 %v1012_v25, %v1010_v14  ;;  %v1003_v6 = vpop.permute.xlu0 %1002 }
 0x3b3   :  { %v903_v11 = vpop.f32.mrf.mxu1  ;;  %v1011_v40 = vmul.f32 %v973_v53, %v947_v26  ;;  %v1013_v44 = vmul.f32 %v978_v56, %v949_v29 }
 0x3b4   :  { %v936_v19 = vmul.f32 0.01, %v902_v7  ;;  %v904_v16 = vadd.f32 %v903_v11, %v771_v51  ;;  %v1014_v35 = vmul.f32 %v983_v60, %v950_v22  ;;  %v951_v36 = vmax.f32 %v898_v10, %v935_v23 }
 0x3b5   :  { %v907_v20 = vpop.f32.mrf.mxu1  ;;  %v1039_v53 = vadd.f32 %v1013_v44, %v1011_v40 }
 0x3b6   :  { %v908_v15 = vadd.f32 %v907_v20, %v776_v52  ;;  %v952_v30 = vmax.f32 %v902_v7, %v936_v19  ;;  %v937_v33 = vmul.f32 0.01, %v904_v16  ;;  %v1027_v51 = vadd.f32 %v1026_v39, %v1014_v35  ;;  %v1008_v20 = vpop.permute.xlu1 %1007  ;;  %v1056_v40 = vpop.permute.xlu0 %1055 }
 0x3b7   :  { %v909_v24 = vpop.f32.mrf.mxu1 }
 0x3b8   :  { %v938_v27 = vmul.f32 0.01, %v908_v15  ;;  %v910_v28 = vadd.f32 %v909_v24, %v776_v52  ;;  %v1016_v45 = vmul.f32 %v988_v21, %v952_v30  ;;  %v953_v46 = vmax.f32 %v904_v16, %v937_v33 }
 0x3b9   :  { %v913_v34 = vpop.f32.mrf.mxu1  ;;  %v1015_v52 = vmul.f32 %v983_v60, %v951_v36 }
 0x3ba   :  { %v939_v31 = vmul.f32 0.01, %v910_v28  ;;  %v914_v37 = vadd.f32 %v913_v34, %v781_v1  ;;  %v954_v41 = vmax.f32 %v908_v15, %v938_v27  ;;  %v1028_v62 = vadd.f32 %v1027_v51, %v1016_v45  ;;  %v1069_v51 = vld [vmem:[%s1669_s11 + $0x8] sm:$0xff] }
 0x3bb   :  { %v915_v38 = vpop.f32.mrf.mxu1  ;;  %v1040_v7 = vadd.f32 %v1039_v53, %v1015_v52  ;;  %v1058_v27 = vlaneseq  ;;  %v1074_v53 = vld [vmem:[%s1669_s11 + $0x30] sm:$0xff] }
 0x3bc   :  { %v916_v42 = vadd.f32 %v915_v38, %v781_v1  ;;  %v940_v47 = vmul.f32 0.01, %v914_v37  ;;  %v955_v54 = vmax.f32 %v910_v28, %v939_v31  ;;  %v1018_v58 = vmul.f32 %v993_v43, %v954_v41 }
 0x3bd   :  { %v919_v48 = vpop.f32.mrf.mxu1  ;;  %v1017_v1 = vmul.f32 %v988_v21, %v953_v46  ;;  %v1059_v35 = vshrl.u32 %v1058_v27, 7 }
 0x3be   :  { %v941_v49 = vmul.f32 0.01, %v916_v42  ;;  %v920_v50 = vadd.f32 %v919_v48, %v786_v17  ;;  %v956_v55 = vmax.f32 %v914_v37, %v940_v47  ;;  %v1019_v8 = vmul.f32 %v993_v43, %v955_v54  ;;  %v1070_v48 = vld [vmem:[%s1669_s11 + $0x10] sm:$0xff]  ;;  %v1073_v54 = vld [vmem:[%s1669_s11 + $0x28] sm:$0xff] }
 0x3bf   :  { %v921_v57 = vpop.f32.mrf.mxu1  ;;  %v1029_v9 = vadd.f32 %v1028_v62, %v1018_v58  ;;  %v1041_v13 = vadd.f32 %v1040_v7, %v1017_v1  ;;  %v1060_v38 = vsub.s32 0, %v1059_v35  ;;  %v1064_v7 = vld [vmem:[%s1668_s12] sm:$0xff] }
 0x3c0   :  { %v942_v59 = vmul.f32 0.01, %v920_v50  ;;  %v922_v63 = vadd.f32 %v921_v57, %v786_v17  ;;  %v957_v2 = vmax.f32 %v916_v42, %v941_v49  ;;  %v1020_v61 = vmul.f32 %v998_v0, %v956_v55  ;;  %v1071_v49 = vld [vmem:[%s1669_s11 + $0x18] sm:$0xff] }
 0x3c1   :  { %v925_v56 = vpop.f32.mrf.mxu1  ;;  %v1042_v15 = vadd.f32 %v1041_v13, %v1019_v8  ;;  %v1061_v44 = vrot.slane %v1056_v40, %v1060_v38  ;;  %v1075_v55 = vld [vmem:[%s1669_s11 + $0x38] sm:$0xff] }
 0x3c2   :  { %v958_v4 = vmax.f32 %v920_v50, %v942_v59  ;;  %v943_v3 = vmul.f32 0.01, %v922_v63  ;;  %v926_v5 = vadd.f32 %v925_v56, %v791_v32  ;;  %v1021_v17 = vmul.f32 %v998_v0, %v957_v2  ;;  %v1068_v50 = vld [vmem:[%s1669_s11] sm:$0xff] }
 0x3c3   :  { %v927_v60 = vpop.f32.mrf.mxu1  ;;  %v1030_v19 = vadd.f32 %v1029_v9, %v1020_v61  ;;  %v1072_v0 = vld [vmem:[%s1669_s11 + $0x20] sm:$0xff] }
 0x3c4   :  { %v1022_v10 = vmul.f32 %v1003_v6, %v958_v4  ;;  %v959_v11 = vmax.f32 %v922_v63, %v943_v3  ;;  %v944_v12 = vmul.f32 0.01, %v926_v5  ;;  %v928_v18 = vadd.f32 %v927_v60, %v791_v32 }
 0x3c5   :  { %v1043_v24 = vadd.f32 %v1042_v15, %v1021_v17 }
 0x3c6   :  { %v960_v16 = vmax.f32 %v926_v5, %v944_v12  ;;  %v1023_v21 = vmul.f32 %v1003_v6, %v959_v11  ;;  %v945_v14 = vmul.f32 0.01, %v928_v18  ;;  %v1031_v22 = vadd.f32 %v1030_v19, %v1022_v10  ;;  %v1065_v6 = vld [vmem:[%s1668_s12 + $0x8] sm:$0xff]  ;;  %v1066_v11 = vld [vmem:[%s1668_s12 + $0x10] sm:$0xff]  ;;  %v1067_v12 = vld [vmem:[%s1668_s12 + $0x18] sm:$0xff] }
 0x3c8   :  { %v1024_v23 = vmul.f32 %v1008_v20, %v960_v16  ;;  %v961_v25 = vmax.f32 %v928_v18, %v945_v14  ;;  %v1044_v28 = vadd.f32 %v1043_v24, %v1023_v21 }
 0x3ca   :  { %v1032_v26 = vadd.f32 %v1031_v22, %v1024_v23  ;;  %v1025_v29 = vmul.f32 %v1008_v20, %v961_v25 }
 0x3cc   :  { %v1033_v30 = vrot.slane %v1032_v26, 4  ;;  %v1045_v33 = vadd.f32 %v1044_v28, %v1025_v29 }
 0x3ce   :  { %v1034_v34 = vadd.f32 %v1033_v30, %v1032_v26  ;;  %v1046_v36 = vrot.slane %v1045_v33, 4 }
 0x3d0   :  { %v1035_v32 = vrot.slane %v1034_v34, 2  ;;  %v1047_v31 = vadd.f32 %v1046_v36, %v1045_v33 }
 0x3d2   :  { %v1036_v37 = vadd.f32 %v1035_v32, %v1034_v34  ;;  %v1048_v39 = vrot.slane %v1047_v31, 2 }
 0x3d4   :  { %v1037_v41 = vrot.slane %v1036_v37, 1  ;;  %v1049_v42 = vadd.f32 %v1048_v39, %v1047_v31 }
 0x3d6   :  { %v1038_v43 = vadd.f32 %v1037_v41, %v1036_v37  ;;  %v1050_v45 = vrot.slane %v1049_v42, 1 }
 0x3d8   :  { %v1051_v46 = vadd.f32 %v1050_v45, %v1049_v42  ;;  %v1062_v47 = vadd.f32 %v1061_v44, %v1038_v43 }
 0x3da   :  { %v1063_v52 = vadd.f32 %v1061_v44, %v1051_v46  ;;  %v1078_v57 = vmul.f32 %v1070_v48, %v1062_v47  ;;  %v1076_v59 = vmul.f32 %v1068_v50, %v1062_v47  ;;  %v1080_v61 = vmul.f32 %v1072_v0, %v1062_v47 }
 0x3db   :  { %v1082_v4 = vmul.f32 %v1074_v53, %v1062_v47 }
 0x3dc   :  { %v1079_v58 = vmul.f32 %v1071_v49, %v1063_v52  ;;  %v1077_v63 = vmul.f32 %v1069_v51, %v1063_v52  ;;  %v1081_v2 = vmul.f32 %v1073_v54, %v1063_v52  ;;  %v1083_v56 = vmul.f32 %v1075_v55, %v1063_v52 }
 0x3de   :  { %v1087_v62 = vadd.f32 %v1079_v58, %v1078_v57  ;;  %v1084_v1 = vadd.f32 %v1077_v63, %v1076_v59  ;;  %v1090_v3 = vadd.f32 %v1081_v2, %v1080_v61  ;;  %v1093_v5 = vadd.f32 %v1083_v56, %v1082_v4 }
 0x3e0   :  { %1088 = vadd.xlane.f32.xlu0 %v1087_v62  ;;  %1085 = vadd.xlane.f32.xlu1 %v1084_v1 }
 0x3e4   :  { %1091 = vadd.xlane.f32.xlu0 %v1090_v3  ;;  %1094 = vadd.xlane.f32.xlu1 %v1093_v5 }
 0x469   :  { %v1089_v8 = vpop.xlane.xlu0 %1088  ;;  %v1086_v60 = vpop.xlane.xlu1 %1085 }
 0x46a   :  { %v1097_v9 = vadd.f32 %v1089_v8, %v1065_v6  ;;  %v1096_v10 = vadd.f32 %v1086_v60, %v1064_v7 }
 0x46c   :  { %1102 = vst.msk [vmem:[%s1668_s12 + $0x8] sm:$0xff] %vm47_vm2, %v1097_v9  ;;  %1101 = vst.msk [vmem:[%s1668_s12] sm:$0xff] %vm47_vm2, %v1096_v10 }
 0x46d   :  { %v1092_v13 = vpop.xlane.xlu0 %1091  ;;  %v1095_v17 = vpop.xlane.xlu1 %1094 }
 0x46e   :  { %v1098_v18 = vadd.f32 %v1092_v13, %v1066_v11  ;;  %v1099_v19 = vadd.f32 %v1095_v17, %v1067_v12 }
 0x470   :  { %1103 = vst.msk [vmem:[%s1668_s12 + $0x10] sm:$0xff] %vm47_vm2, %v1098_v18  ;;  %1104 = vst.msk [vmem:[%s1668_s12 + $0x18] sm:$0xff] %vm47_vm2, %v1099_v19 }
 0x473   :  { %v1109_v16 = vld [vmem:[%s1668_s12 + $0x8] sm:$0xff]  ;;  %v1108_v20 = vld [vmem:[%s1668_s12] sm:$0xff] }
 0x474   :  { %v1113_v15 = vmul.f32 0.01, %v1109_v16  ;;  %v1112_v21 = vmul.f32 0.01, %v1108_v20 }
 0x476   :  { %v1117_v14 = vmax.f32 %v1109_v16, %v1113_v15  ;;  %v1116_v22 = vmax.f32 %v1108_v20, %v1112_v21 }
 0x477   :  { %v1110_v23 = vld [vmem:[%s1668_s12 + $0x10] sm:$0xff]  ;;  %v1111_v24 = vld [vmem:[%s1668_s12 + $0x18] sm:$0xff] }
 0x478   :  { %1121 = vst.msk [vmem:[%s1668_s12 + $0x8] sm:$0xff] %vm47_vm2, %v1117_v14  ;;  %1120 = vst.msk [vmem:[%s1668_s12] sm:$0xff] %vm47_vm2, %v1116_v22  ;;  %v1114_v25 = vmul.f32 0.01, %v1110_v23  ;;  %v1115_v26 = vmul.f32 0.01, %v1111_v24 }
 0x47a   :  { %v1118_v27 = vmax.f32 %v1110_v23, %v1114_v25  ;;  %v1119_v28 = vmax.f32 %v1111_v24, %v1115_v26 }
 0x47c   :  { %1122 = vst.msk [vmem:[%s1668_s12 + $0x10] sm:$0xff] %vm47_vm2, %v1118_v27  ;;  %1123 = vst.msk [vmem:[%s1668_s12 + $0x18] sm:$0xff] %vm47_vm2, %v1119_v28 }

</bundles_post_ra>
